<compile_context>
chip_gen: v6e
topology: v6e:2x2x1
jax: 0.10.0
libtpu: 0.0.40
codegen_flags: <defaults>
</compile_context>

<pallas_src>
import functools
import math

import jax
import jax.numpy as jnp
from jax.experimental import pallas as pl
from jax.experimental.pallas import tpu as pltpu

# ---- model hyper-parameters (small, consistent with the module's forward) ----
D_MODEL = 32      # d_model
N_HEADS = 4       # n_heads
D_HEAD = D_MODEL // N_HEADS
DIM_FFN = 64      # dim_FFN
N_LAYERS = 3
SEQ = 8
BATCH = 2
LN_EPS = 1e-5


def _layer_norm(x, w, b):
    mu = jnp.mean(x, axis=-1, keepdims=True)
    var = jnp.mean((x - mu) ** 2, axis=-1, keepdims=True)
    return (x - mu) * jax.lax.rsqrt(var + LN_EPS) * w + b


def encoder_kernel(
    x_ref,                                   # (1, S, D)   one batch element
    wq_ref, wk_ref, wv_ref,                  # (H, D, Dh)  per-head in-proj (pre-transposed)
    bq_ref, bk_ref, bv_ref,                  # (H, 1, Dh)
    wo_ref,                                  # (H, Dh, D)  per-head rows of out_proj.weight^T
    bo_ref,                                  # (1, D)
    ln1w_ref, ln1b_ref,                      # (1, D)
    w1_ref, b1_ref,                          # (D, F), (1, F)   FFN linear1 (pre-transposed)
    w2_ref, b2_ref,                          # (F, D), (1, D)   FFN linear2 (pre-transposed)
    ln2w_ref, ln2b_ref,                      # (1, D)
    o_ref,                                   # (1, S, D)
    *, n_layers, n_heads,
):
    x = x_ref[0].astype(jnp.float32)                       # (S, D)
    seq, d_model = x.shape
    d_head = d_model // n_heads
    scale = 1.0 / math.sqrt(d_head)

    # Load shared weights once; reused across the fused layer loop.
    wq = wq_ref[...]; wk = wk_ref[...]; wv = wv_ref[...]
    bq = bq_ref[...]; bk = bk_ref[...]; bv = bv_ref[...]
    wo = wo_ref[...]; bo = bo_ref[...]
    ln1w = ln1w_ref[...]; ln1b = ln1b_ref[...]
    w1 = w1_ref[...]; b1 = b1_ref[...]
    w2 = w2_ref[...]; b2 = b2_ref[...]
    ln2w = ln2w_ref[...]; ln2b = ln2b_ref[...]

    for _ in range(n_layers):                # shared weights across all layers
        # ---- multi-head self-attention (Q = K = V = x), batched over heads ----
        xh = jnp.broadcast_to(x, (n_heads, seq, d_model))  # (H, S, D)
        q = (jnp.einsum('hsd,hde->hse', xh, wq,
                        preferred_element_type=jnp.float32) + bq) * scale
        k = jnp.einsum('hsd,hde->hse', xh, wk,
                       preferred_element_type=jnp.float32) + bk
        v = jnp.einsum('hsd,hde->hse', xh, wv,
                       preferred_element_type=jnp.float32) + bv
        s = jnp.einsum('hqe,hke->hqk', q, k,
                       preferred_element_type=jnp.float32)          # (H, S, S)
        s = s - jnp.max(s, axis=-1, keepdims=True)
        p = jnp.exp(s)
        p = p * pl.reciprocal(jnp.sum(p, axis=-1, keepdims=True), approx=True)
        ctx = jnp.einsum('hqk,hke->hqe', p, v,
                         preferred_element_type=jnp.float32)        # (H, S, Dh)

        # Out-projection folded per head: concat(heads) @ Wo^T == sum_h ctx_h @ Wo^T[h-rows].
        attn = jnp.dot(ctx[0], wo[0], preferred_element_type=jnp.float32)
        for h in range(1, n_heads):
            attn = attn + jnp.dot(ctx[h], wo[h], preferred_element_type=jnp.float32)
        attn = attn + bo

        # ---- residual + LayerNorm1 ----
        x = _layer_norm(x + attn, ln1w, ln1b)

        # ---- FFN: Linear -> ReLU -> Linear, residual + LayerNorm2 ----
        h1 = jnp.maximum(
            jnp.dot(x, w1, preferred_element_type=jnp.float32) + b1, 0.0)
        ffn = jnp.dot(h1, w2, preferred_element_type=jnp.float32) + b2
        x = _layer_norm(x + ffn, ln2w, ln2b)

    o_ref[0] = x.astype(o_ref.dtype)


def _replicated_spec(shape):
    zeros = (0,) * len(shape)
    return pl.BlockSpec(shape, lambda b, _z=zeros: _z)


def _prepare_kernel_params(p):
    """PyTorch-layout params -> kernel layout (pre-transposed, pre-split per head)."""
    D, H = D_MODEL, N_HEADS
    Dh = D // H
    f32 = jnp.float32

    def per_head_in(w):      # (D, D) torch (out,in) -> (H, D, Dh): x @ w_h == head-h slice of x @ w.T
        return jnp.transpose(w.reshape(H, Dh, D), (0, 2, 1)).astype(f32)

    w_in, b_in = p["w_in"], p["b_in"]
    return {
        "wq": per_head_in(w_in[0 * D:1 * D]),
        "wk": per_head_in(w_in[1 * D:2 * D]),
        "wv": per_head_in(w_in[2 * D:3 * D]),
        "bq": b_in[0 * D:1 * D].reshape(H, 1, Dh).astype(f32),
        "bk": b_in[1 * D:2 * D].reshape(H, 1, Dh).astype(f32),
        "bv": b_in[2 * D:3 * D].reshape(H, 1, Dh).astype(f32),
        "wo": jnp.transpose(p["w_out"], (1, 0)).reshape(H, Dh, D).astype(f32),
        "bo": p["b_out"].reshape(1, D).astype(f32),
        "ln1w": p["ln1_w"].reshape(1, D).astype(f32),
        "ln1b": p["ln1_b"].reshape(1, D).astype(f32),
        "w1": jnp.transpose(p["w1"], (1, 0)).astype(f32),     # (D, F)
        "b1": p["b1"].reshape(1, DIM_FFN).astype(f32),
        "w2": jnp.transpose(p["w2"], (1, 0)).astype(f32),     # (F, D)
        "b2": p["b2"].reshape(1, D).astype(f32),
        "ln2w": p["ln2_w"].reshape(1, D).astype(f32),
        "ln2b": p["ln2_b"].reshape(1, D).astype(f32),
    }


@functools.partial(jax.jit, static_argnames=("n_layers",))
def encoder_forward(x_sbd, params, n_layers=N_LAYERS):
    """Encoder forward. x_sbd: (S, B, D), PyTorch (seq, batch, embed) layout."""
    S, B, D = x_sbd.shape
    kp = _prepare_kernel_params(params)
    x_bsd = jnp.transpose(x_sbd, (1, 0, 2))        # per-batch contiguous (S, D) slabs
    weights = (kp["wq"], kp["wk"], kp["wv"], kp["bq"], kp["bk"], kp["bv"],
               kp["wo"], kp["bo"], kp["ln1w"], kp["ln1b"],
               kp["w1"], kp["b1"], kp["w2"], kp["b2"], kp["ln2w"], kp["ln2b"])
    kernel = functools.partial(encoder_kernel, n_layers=n_layers, n_heads=N_HEADS)

    out = pl.pallas_call(
        kernel,
        out_shape=jax.ShapeDtypeStruct((B, S, D), jnp.float32),
        grid_spec=pltpu.PrefetchScalarGridSpec(
            num_scalar_prefetch=0,
            grid=(B,),                               # one program per batch element
            in_specs=[pl.BlockSpec((1, S, D), lambda b: (b, 0, 0))]
                     + [_replicated_spec(w.shape) for w in weights],
            out_specs=pl.BlockSpec((1, S, D), lambda b: (b, 0, 0)),
        ),
        compiler_params=pltpu.CompilerParams(
            dimension_semantics=("parallel",)),      # v7x: batch -> 2 TensorCores
    )(x_bsd, *weights)
    # self.norm is None in the reference Encoder default.
    return jnp.transpose(out, (1, 0, 2))             # back to (S, B, D)


# ---------------- pure-JAX reference (mirrors the PyTorch module) ----------------
def encoder_reference(x_sbd, params, n_layers=N_LAYERS):
    D, H = D_MODEL, N_HEADS
    Dh = D // H
    x = x_sbd.astype(jnp.float32)

    def ln(y, w, b):
        mu = jnp.mean(y, axis=-1, keepdims=True)
        var = jnp.mean((y - mu) ** 2, axis=-1, keepdims=True)
        return (y - mu) / jnp.sqrt(var + LN_EPS) * w + b

    for _ in range(n_layers):
        S, B, _ = x.shape
        qkv = jnp.einsum('sbd,ed->sbe', x, params["w_in"]) + params["b_in"]
        q, k, v = qkv[..., :D], qkv[..., D:2 * D], qkv[..., 2 * D:]

        def split(t):                                 # (S,B,D) -> (B,H,S,Dh)
            return jnp.transpose(t.reshape(S, B, H, Dh), (1, 2, 0, 3))

        qh, kh, vh = split(q), split(k), split(v)
        qh = qh / math.sqrt(Dh)
        logits = jnp.einsum('bhqe,bhke->bhqk', qh, kh)
        probs = jax.nn.softmax(logits, axis=-1)
        ctx = jnp.einsum('bhqk,bhke->bhqe', probs, vh)
        ctx = jnp.transpose(ctx, (2, 0, 1, 3)).reshape(S, B, D)
        attn = jnp.einsum('sbd,ed->sbe', ctx, params["w_out"]) + params["b_out"]
        x = ln(x + attn, params["ln1_w"], params["ln1_b"])
        h1 = jax.nn.relu(jnp.einsum('sbd,fd->sbf', x, params["w1"]) + params["b1"])
        ffn = jnp.einsum('sbf,df->sbd', h1, params["w2"]) + params["b2"]
        x = ln(x + ffn, params["ln2_w"], params["ln2_b"])
    return x


def init_params(key):
    ks = jax.random.split(key, 10)
    s = 0.02
    return {
        "w_in":  s * jax.random.normal(ks[0], (3 * D_MODEL, D_MODEL), jnp.float32),
        "b_in":  s * jax.random.normal(ks[1], (3 * D_MODEL,), jnp.float32),
        "w_out": s * jax.random.normal(ks[2], (D_MODEL, D_MODEL), jnp.float32),
        "b_out": s * jax.random.normal(ks[3], (D_MODEL,), jnp.float32),
        "ln1_w": 1.0 + 0.1 * jax.random.normal(ks[4], (D_MODEL,), jnp.float32),
        "ln1_b": 0.1 * jax.random.normal(ks[5], (D_MODEL,), jnp.float32),
        "w1":    s * jax.random.normal(ks[6], (DIM_FFN, D_MODEL), jnp.float32),
        "b1":    s * jax.random.normal(ks[7], (DIM_FFN,), jnp.float32),
        "w2":    s * jax.random.normal(ks[8], (D_MODEL, DIM_FFN), jnp.float32),
        "b2":    s * jax.random.normal(ks[9], (D_MODEL,), jnp.float32),
        "ln2_w": jnp.ones((D_MODEL,), jnp.float32),
        "ln2_b": jnp.zeros((D_MODEL,), jnp.float32),
    }


if __name__ == "__main__":
    key = jax.random.PRNGKey(0)
    k_x, k_p = jax.random.split(key)
    # x: (seq, batch, d_model) matching PyTorch MultiheadAttention default layout.
    x = jax.random.normal(k_x, (SEQ, BATCH, D_MODEL), jnp.float32)
    params = init_params(k_p)

    out = jax.block_until_ready(encoder_forward(x, params))
    assert out.shape == (SEQ, BATCH, D_MODEL)
    assert bool(jnp.all(jnp.isfinite(out)))

    ref = jax.block_until_ready(encoder_reference(x, params))
    max_err = float(jnp.max(jnp.abs(out - ref)))
    assert max_err < 3e-2, f"kernel/reference mismatch: {max_err}"
    print("KERNEL_OK")
</pallas_src>

<mosaic_0001>
module attributes {stable_mosaic.version = 11 : i64} {
  func.func @encoder_kernel(%arg0: i32, %arg1: memref<1x8x32xf32, #tpu.memory_space<vmem>>, %arg2: memref<4x32x8xf32, #tpu.memory_space<vmem>>, %arg3: memref<4x32x8xf32, #tpu.memory_space<vmem>>, %arg4: memref<4x32x8xf32, #tpu.memory_space<vmem>>, %arg5: memref<4x1x8xf32, #tpu.memory_space<vmem>>, %arg6: memref<4x1x8xf32, #tpu.memory_space<vmem>>, %arg7: memref<4x1x8xf32, #tpu.memory_space<vmem>>, %arg8: memref<4x8x32xf32, #tpu.memory_space<vmem>>, %arg9: memref<1x32xf32, #tpu.memory_space<vmem>>, %arg10: memref<1x32xf32, #tpu.memory_space<vmem>>, %arg11: memref<1x32xf32, #tpu.memory_space<vmem>>, %arg12: memref<32x64xf32, #tpu.memory_space<vmem>>, %arg13: memref<1x64xf32, #tpu.memory_space<vmem>>, %arg14: memref<64x32xf32, #tpu.memory_space<vmem>>, %arg15: memref<1x32xf32, #tpu.memory_space<vmem>>, %arg16: memref<1x32xf32, #tpu.memory_space<vmem>>, %arg17: memref<1x32xf32, #tpu.memory_space<vmem>>, %arg18: memref<1x8x32xf32, #tpu.memory_space<vmem>>) attributes {dimension_semantics = [#tpu.dimension_semantics<parallel>], iteration_bounds = array<i64: 2>, scalar_prefetch = 0 : i64, scratch_operands = 0 : i64, tpu.core_type = #tpu.core_type<tc>, window_params = [{transform_indices = @transform_0, window_bounds = array<i64: 1, 8, 32>}, {pipeline_mode = #tpu.pipeline_mode<synchronous>, transform_indices = @transform_1, window_bounds = array<i64: 4, 32, 8>}, {pipeline_mode = #tpu.pipeline_mode<synchronous>, transform_indices = @transform_2, window_bounds = array<i64: 4, 32, 8>}, {pipeline_mode = #tpu.pipeline_mode<synchronous>, transform_indices = @transform_3, window_bounds = array<i64: 4, 32, 8>}, {pipeline_mode = #tpu.pipeline_mode<synchronous>, transform_indices = @transform_4, window_bounds = array<i64: 4, 1, 8>}, {pipeline_mode = #tpu.pipeline_mode<synchronous>, transform_indices = @transform_5, window_bounds = array<i64: 4, 1, 8>}, {pipeline_mode = #tpu.pipeline_mode<synchronous>, transform_indices = @transform_6, window_bounds = array<i64: 4, 1, 8>}, {pipeline_mode = #tpu.pipeline_mode<synchronous>, transform_indices = @transform_7, window_bounds = array<i64: 4, 8, 32>}, {pipeline_mode = #tpu.pipeline_mode<synchronous>, transform_indices = @transform_8, window_bounds = array<i64: 1, 32>}, {pipeline_mode = #tpu.pipeline_mode<synchronous>, transform_indices = @transform_9, window_bounds = array<i64: 1, 32>}, {pipeline_mode = #tpu.pipeline_mode<synchronous>, transform_indices = @transform_10, window_bounds = array<i64: 1, 32>}, {pipeline_mode = #tpu.pipeline_mode<synchronous>, transform_indices = @transform_11, window_bounds = array<i64: 32, 64>}, {pipeline_mode = #tpu.pipeline_mode<synchronous>, transform_indices = @transform_12, window_bounds = array<i64: 1, 64>}, {pipeline_mode = #tpu.pipeline_mode<synchronous>, transform_indices = @transform_13, window_bounds = array<i64: 64, 32>}, {pipeline_mode = #tpu.pipeline_mode<synchronous>, transform_indices = @transform_14, window_bounds = array<i64: 1, 32>}, {pipeline_mode = #tpu.pipeline_mode<synchronous>, transform_indices = @transform_15, window_bounds = array<i64: 1, 32>}, {pipeline_mode = #tpu.pipeline_mode<synchronous>, transform_indices = @transform_16, window_bounds = array<i64: 1, 32>}, {transform_indices = @transform_17, window_bounds = array<i64: 1, 8, 32>}]} {
    %c0 = arith.constant 0 : index
    %c0_0 = arith.constant 0 : index
    %c0_1 = arith.constant 0 : index
    %0 = vector.load %arg1[%c0, %c0_0, %c0_1] : memref<1x8x32xf32, #tpu.memory_space<vmem>>, vector<1x8x32xf32>
    %1 = vector.shape_cast %0 : vector<1x8x32xf32> to vector<8x32xf32>
    %c0_2 = arith.constant 0 : index
    %c0_3 = arith.constant 0 : index
    %c0_4 = arith.constant 0 : index
    %2 = vector.load %arg2[%c0_2, %c0_3, %c0_4] : memref<4x32x8xf32, #tpu.memory_space<vmem>>, vector<4x32x8xf32>
    %c0_5 = arith.constant 0 : index
    %c0_6 = arith.constant 0 : index
    %c0_7 = arith.constant 0 : index
    %3 = vector.load %arg3[%c0_5, %c0_6, %c0_7] : memref<4x32x8xf32, #tpu.memory_space<vmem>>, vector<4x32x8xf32>
    %c0_8 = arith.constant 0 : index
    %c0_9 = arith.constant 0 : index
    %c0_10 = arith.constant 0 : index
    %4 = vector.load %arg4[%c0_8, %c0_9, %c0_10] : memref<4x32x8xf32, #tpu.memory_space<vmem>>, vector<4x32x8xf32>
    %c0_11 = arith.constant 0 : index
    %c0_12 = arith.constant 0 : index
    %c0_13 = arith.constant 0 : index
    %5 = vector.load %arg5[%c0_11, %c0_12, %c0_13] : memref<4x1x8xf32, #tpu.memory_space<vmem>>, vector<4x1x8xf32>
    %c0_14 = arith.constant 0 : index
    %c0_15 = arith.constant 0 : index
    %c0_16 = arith.constant 0 : index
    %6 = vector.load %arg6[%c0_14, %c0_15, %c0_16] : memref<4x1x8xf32, #tpu.memory_space<vmem>>, vector<4x1x8xf32>
    %c0_17 = arith.constant 0 : index
    %c0_18 = arith.constant 0 : index
    %c0_19 = arith.constant 0 : index
    %7 = vector.load %arg7[%c0_17, %c0_18, %c0_19] : memref<4x1x8xf32, #tpu.memory_space<vmem>>, vector<4x1x8xf32>
    %c0_20 = arith.constant 0 : index
    %c0_21 = arith.constant 0 : index
    %c0_22 = arith.constant 0 : index
    %8 = vector.load %arg8[%c0_20, %c0_21, %c0_22] : memref<4x8x32xf32, #tpu.memory_space<vmem>>, vector<4x8x32xf32>
    %c0_23 = arith.constant 0 : index
    %c0_24 = arith.constant 0 : index
    %9 = vector.load %arg9[%c0_23, %c0_24] : memref<1x32xf32, #tpu.memory_space<vmem>>, vector<1x32xf32>
    %c0_25 = arith.constant 0 : index
    %c0_26 = arith.constant 0 : index
    %10 = vector.load %arg10[%c0_25, %c0_26] : memref<1x32xf32, #tpu.memory_space<vmem>>, vector<1x32xf32>
    %c0_27 = arith.constant 0 : index
    %c0_28 = arith.constant 0 : index
    %11 = vector.load %arg11[%c0_27, %c0_28] : memref<1x32xf32, #tpu.memory_space<vmem>>, vector<1x32xf32>
    %c0_29 = arith.constant 0 : index
    %c0_30 = arith.constant 0 : index
    %12 = vector.load %arg12[%c0_29, %c0_30] : memref<32x64xf32, #tpu.memory_space<vmem>>, vector<32x64xf32>
    %c0_31 = arith.constant 0 : index
    %c0_32 = arith.constant 0 : index
    %13 = vector.load %arg13[%c0_31, %c0_32] : memref<1x64xf32, #tpu.memory_space<vmem>>, vector<1x64xf32>
    %c0_33 = arith.constant 0 : index
    %c0_34 = arith.constant 0 : index
    %14 = vector.load %arg14[%c0_33, %c0_34] : memref<64x32xf32, #tpu.memory_space<vmem>>, vector<64x32xf32>
    %c0_35 = arith.constant 0 : index
    %c0_36 = arith.constant 0 : index
    %15 = vector.load %arg15[%c0_35, %c0_36] : memref<1x32xf32, #tpu.memory_space<vmem>>, vector<1x32xf32>
    %c0_37 = arith.constant 0 : index
    %c0_38 = arith.constant 0 : index
    %16 = vector.load %arg16[%c0_37, %c0_38] : memref<1x32xf32, #tpu.memory_space<vmem>>, vector<1x32xf32>
    %c0_39 = arith.constant 0 : index
    %c0_40 = arith.constant 0 : index
    %17 = vector.load %arg17[%c0_39, %c0_40] : memref<1x32xf32, #tpu.memory_space<vmem>>, vector<1x32xf32>
    %18 = vector.shape_cast %1 : vector<8x32xf32> to vector<1x8x32xf32>
    %19 = vector.broadcast %18 : vector<1x8x32xf32> to vector<4x8x32xf32>
    "tpu.trace_start"() <{level = 10 : i32, message = "hsd,hde->hse"}> : () -> ()
    %cst = arith.constant dense<0.000000e+00> : vector<4x8x8xf32>
    %20 = tpu.matmul %19, %2, %cst {dimension_numbers = #tpu.dot_dimension_numbers<[2], [1], [1], [2], [0, 0, 0, 1, 1, 2], [0], [0]>} : vector<4x8x32xf32>, vector<4x32x8xf32>, vector<4x8x8xf32> -> vector<4x8x8xf32>
    "tpu.trace_stop"() : () -> ()
    %21 = vector.broadcast %5 : vector<4x1x8xf32> to vector<4x8x8xf32>
    %22 = arith.addf %20, %21 : vector<4x8x8xf32>
    %cst_41 = arith.constant 0.353553385 : f32
    %23 = vector.broadcast %cst_41 : f32 to vector<4x8x8xf32>
    %24 = arith.mulf %22, %23 : vector<4x8x8xf32>
    "tpu.trace_start"() <{level = 10 : i32, message = "hsd,hde->hse"}> : () -> ()
    %cst_42 = arith.constant dense<0.000000e+00> : vector<4x8x8xf32>
    %25 = tpu.matmul %19, %3, %cst_42 {dimension_numbers = #tpu.dot_dimension_numbers<[2], [1], [1], [2], [0, 0, 0, 1, 1, 2], [0], [0]>} : vector<4x8x32xf32>, vector<4x32x8xf32>, vector<4x8x8xf32> -> vector<4x8x8xf32>
    "tpu.trace_stop"() : () -> ()
    %26 = vector.broadcast %6 : vector<4x1x8xf32> to vector<4x8x8xf32>
    %27 = arith.addf %25, %26 : vector<4x8x8xf32>
    "tpu.trace_start"() <{level = 10 : i32, message = "hsd,hde->hse"}> : () -> ()
    %cst_43 = arith.constant dense<0.000000e+00> : vector<4x8x8xf32>
    %28 = tpu.matmul %19, %4, %cst_43 {dimension_numbers = #tpu.dot_dimension_numbers<[2], [1], [1], [2], [0, 0, 0, 1, 1, 2], [0], [0]>} : vector<4x8x32xf32>, vector<4x32x8xf32>, vector<4x8x8xf32> -> vector<4x8x8xf32>
    "tpu.trace_stop"() : () -> ()
    %29 = vector.broadcast %7 : vector<4x1x8xf32> to vector<4x8x8xf32>
    %30 = arith.addf %28, %29 : vector<4x8x8xf32>
    "tpu.trace_start"() <{level = 10 : i32, message = "hqe,hke->hqk"}> : () -> ()
    %cst_44 = arith.constant dense<0.000000e+00> : vector<4x8x8xf32>
    %31 = tpu.matmul %24, %27, %cst_44 {dimension_numbers = #tpu.dot_dimension_numbers<[2], [2], [1], [1], [0, 0, 0, 1, 1, 1], [0], [0]>} : vector<4x8x8xf32>, vector<4x8x8xf32>, vector<4x8x8xf32> -> vector<4x8x8xf32>
    "tpu.trace_stop"() : () -> ()
    %cst_45 = arith.constant dense<0xFF800000> : vector<4x8xf32>
    %32 = vector.multi_reduction <maximumf>, %31, %cst_45 [2] : vector<4x8x8xf32> to vector<4x8xf32>
    %33 = vector.shape_cast %32 : vector<4x8xf32> to vector<4x8x1xf32>
    %34 = vector.broadcast %33 : vector<4x8x1xf32> to vector<4x8x8xf32>
    %35 = arith.subf %31, %34 : vector<4x8x8xf32>
    %36 = math.exp %35 : vector<4x8x8xf32>
    %cst_46 = arith.constant dense<0.000000e+00> : vector<4x8xf32>
    %37 = vector.multi_reduction <add>, %36, %cst_46 [2] : vector<4x8x8xf32> to vector<4x8xf32>
    %38 = vector.shape_cast %37 : vector<4x8xf32> to vector<4x8x1xf32>
    %39 = tpu.reciprocal %38 {approx = true} : vector<4x8x1xf32> -> vector<4x8x1xf32>
    %40 = vector.broadcast %39 : vector<4x8x1xf32> to vector<4x8x8xf32>
    %41 = arith.mulf %36, %40 : vector<4x8x8xf32>
    "tpu.trace_start"() <{level = 10 : i32, message = "hqk,hke->hqe"}> : () -> ()
    %cst_47 = arith.constant dense<0.000000e+00> : vector<4x8x8xf32>
    %42 = tpu.matmul %41, %30, %cst_47 {dimension_numbers = #tpu.dot_dimension_numbers<[2], [1], [1], [2], [0, 0, 0, 1, 1, 2], [0], [0]>} : vector<4x8x8xf32>, vector<4x8x8xf32>, vector<4x8x8xf32> -> vector<4x8x8xf32>
    "tpu.trace_stop"() : () -> ()
    %43 = vector.extract_strided_slice %42 {offsets = [0, 0, 0], sizes = [1, 8, 8], strides = [1, 1, 1]} : vector<4x8x8xf32> to vector<1x8x8xf32>
    %44 = vector.shape_cast %43 : vector<1x8x8xf32> to vector<8x8xf32>
    %45 = vector.extract_strided_slice %8 {offsets = [0, 0, 0], sizes = [1, 8, 32], strides = [1, 1, 1]} : vector<4x8x32xf32> to vector<1x8x32xf32>
    %46 = vector.shape_cast %45 : vector<1x8x32xf32> to vector<8x32xf32>
    %cst_48 = arith.constant dense<0.000000e+00> : vector<8x32xf32>
    %47 = tpu.matmul %44, %46, %cst_48 {dimension_numbers = #tpu.dot_dimension_numbers<[1], [0], [0], [1], [0, 0, 1, 1], [], []>} : vector<8x8xf32>, vector<8x32xf32>, vector<8x32xf32> -> vector<8x32xf32>
    %48 = vector.extract_strided_slice %42 {offsets = [1, 0, 0], sizes = [1, 8, 8], strides = [1, 1, 1]} : vector<4x8x8xf32> to vector<1x8x8xf32>
    %49 = vector.shape_cast %48 : vector<1x8x8xf32> to vector<8x8xf32>
    %50 = vector.extract_strided_slice %8 {offsets = [1, 0, 0], sizes = [1, 8, 32], strides = [1, 1, 1]} : vector<4x8x32xf32> to vector<1x8x32xf32>
    %51 = vector.shape_cast %50 : vector<1x8x32xf32> to vector<8x32xf32>
    %cst_49 = arith.constant dense<0.000000e+00> : vector<8x32xf32>
    %52 = tpu.matmul %49, %51, %cst_49 {dimension_numbers = #tpu.dot_dimension_numbers<[1], [0], [0], [1], [0, 0, 1, 1], [], []>} : vector<8x8xf32>, vector<8x32xf32>, vector<8x32xf32> -> vector<8x32xf32>
    %53 = arith.addf %47, %52 : vector<8x32xf32>
    %54 = vector.extract_strided_slice %42 {offsets = [2, 0, 0], sizes = [1, 8, 8], strides = [1, 1, 1]} : vector<4x8x8xf32> to vector<1x8x8xf32>
    %55 = vector.shape_cast %54 : vector<1x8x8xf32> to vector<8x8xf32>
    %56 = vector.extract_strided_slice %8 {offsets = [2, 0, 0], sizes = [1, 8, 32], strides = [1, 1, 1]} : vector<4x8x32xf32> to vector<1x8x32xf32>
    %57 = vector.shape_cast %56 : vector<1x8x32xf32> to vector<8x32xf32>
    %cst_50 = arith.constant dense<0.000000e+00> : vector<8x32xf32>
    %58 = tpu.matmul %55, %57, %cst_50 {dimension_numbers = #tpu.dot_dimension_numbers<[1], [0], [0], [1], [0, 0, 1, 1], [], []>} : vector<8x8xf32>, vector<8x32xf32>, vector<8x32xf32> -> vector<8x32xf32>
    %59 = arith.addf %53, %58 : vector<8x32xf32>
    %60 = vector.extract_strided_slice %42 {offsets = [3, 0, 0], sizes = [1, 8, 8], strides = [1, 1, 1]} : vector<4x8x8xf32> to vector<1x8x8xf32>
    %61 = vector.shape_cast %60 : vector<1x8x8xf32> to vector<8x8xf32>
    %62 = vector.extract_strided_slice %8 {offsets = [3, 0, 0], sizes = [1, 8, 32], strides = [1, 1, 1]} : vector<4x8x32xf32> to vector<1x8x32xf32>
    %63 = vector.shape_cast %62 : vector<1x8x32xf32> to vector<8x32xf32>
    %cst_51 = arith.constant dense<0.000000e+00> : vector<8x32xf32>
    %64 = tpu.matmul %61, %63, %cst_51 {dimension_numbers = #tpu.dot_dimension_numbers<[1], [0], [0], [1], [0, 0, 1, 1], [], []>} : vector<8x8xf32>, vector<8x32xf32>, vector<8x32xf32> -> vector<8x32xf32>
    %65 = arith.addf %59, %64 : vector<8x32xf32>
    %66 = vector.broadcast %9 : vector<1x32xf32> to vector<8x32xf32>
    %67 = arith.addf %65, %66 : vector<8x32xf32>
    %68 = arith.addf %1, %67 : vector<8x32xf32>
    %cst_52 = arith.constant dense<0.000000e+00> : vector<8xf32>
    %69 = vector.multi_reduction <add>, %68, %cst_52 [1] : vector<8x32xf32> to vector<8xf32>
    %70 = vector.shape_cast %69 : vector<8xf32> to vector<8x1xf32>
    %cst_53 = arith.constant 3.200000e+01 : f32
    %71 = vector.broadcast %cst_53 : f32 to vector<8x1xf32>
    %72 = arith.divf %70, %71 : vector<8x1xf32>
    %73 = vector.broadcast %72 : vector<8x1xf32> to vector<8x32xf32>
    %74 = arith.subf %68, %73 : vector<8x32xf32>
    %75 = arith.mulf %74, %74 : vector<8x32xf32>
    %cst_54 = arith.constant dense<0.000000e+00> : vector<8xf32>
    %76 = vector.multi_reduction <add>, %75, %cst_54 [1] : vector<8x32xf32> to vector<8xf32>
    %77 = vector.shape_cast %76 : vector<8xf32> to vector<8x1xf32>
    %cst_55 = arith.constant 3.200000e+01 : f32
    %78 = vector.broadcast %cst_55 : f32 to vector<8x1xf32>
    %79 = arith.divf %77, %78 : vector<8x1xf32>
    %80 = vector.broadcast %72 : vector<8x1xf32> to vector<8x32xf32>
    %81 = arith.subf %68, %80 : vector<8x32xf32>
    %cst_56 = arith.constant 9.99999974E-6 : f32
    %82 = vector.broadcast %cst_56 : f32 to vector<8x1xf32>
    %83 = arith.addf %79, %82 : vector<8x1xf32>
    %84 = math.rsqrt %83 : vector<8x1xf32>
    %85 = vector.broadcast %84 : vector<8x1xf32> to vector<8x32xf32>
    %86 = arith.mulf %81, %85 : vector<8x32xf32>
    %87 = vector.broadcast %10 : vector<1x32xf32> to vector<8x32xf32>
    %88 = arith.mulf %86, %87 : vector<8x32xf32>
    %89 = vector.broadcast %11 : vector<1x32xf32> to vector<8x32xf32>
    %90 = arith.addf %88, %89 : vector<8x32xf32>
    %cst_57 = arith.constant dense<0.000000e+00> : vector<8x64xf32>
    %91 = tpu.matmul %90, %12, %cst_57 {dimension_numbers = #tpu.dot_dimension_numbers<[1], [0], [0], [1], [0, 0, 1, 1], [], []>} : vector<8x32xf32>, vector<32x64xf32>, vector<8x64xf32> -> vector<8x64xf32>
    %92 = vector.broadcast %13 : vector<1x64xf32> to vector<8x64xf32>
    %93 = arith.addf %91, %92 : vector<8x64xf32>
    %cst_58 = arith.constant 0.000000e+00 : f32
    %94 = vector.broadcast %cst_58 : f32 to vector<8x64xf32>
    %95 = arith.maximumf %93, %94 : vector<8x64xf32>
    %cst_59 = arith.constant dense<0.000000e+00> : vector<8x32xf32>
    %96 = tpu.matmul %95, %14, %cst_59 {dimension_numbers = #tpu.dot_dimension_numbers<[1], [0], [0], [1], [0, 0, 1, 1], [], []>} : vector<8x64xf32>, vector<64x32xf32>, vector<8x32xf32> -> vector<8x32xf32>
    %97 = vector.broadcast %15 : vector<1x32xf32> to vector<8x32xf32>
    %98 = arith.addf %96, %97 : vector<8x32xf32>
    %99 = arith.addf %90, %98 : vector<8x32xf32>
    %cst_60 = arith.constant dense<0.000000e+00> : vector<8xf32>
    %100 = vector.multi_reduction <add>, %99, %cst_60 [1] : vector<8x32xf32> to vector<8xf32>
    %101 = vector.shape_cast %100 : vector<8xf32> to vector<8x1xf32>
    %cst_61 = arith.constant 3.200000e+01 : f32
    %102 = vector.broadcast %cst_61 : f32 to vector<8x1xf32>
    %103 = arith.divf %101, %102 : vector<8x1xf32>
    %104 = vector.broadcast %103 : vector<8x1xf32> to vector<8x32xf32>
    %105 = arith.subf %99, %104 : vector<8x32xf32>
    %106 = arith.mulf %105, %105 : vector<8x32xf32>
    %cst_62 = arith.constant dense<0.000000e+00> : vector<8xf32>
    %107 = vector.multi_reduction <add>, %106, %cst_62 [1] : vector<8x32xf32> to vector<8xf32>
    %108 = vector.shape_cast %107 : vector<8xf32> to vector<8x1xf32>
    %cst_63 = arith.constant 3.200000e+01 : f32
    %109 = vector.broadcast %cst_63 : f32 to vector<8x1xf32>
    %110 = arith.divf %108, %109 : vector<8x1xf32>
    %111 = vector.broadcast %103 : vector<8x1xf32> to vector<8x32xf32>
    %112 = arith.subf %99, %111 : vector<8x32xf32>
    %cst_64 = arith.constant 9.99999974E-6 : f32
    %113 = vector.broadcast %cst_64 : f32 to vector<8x1xf32>
    %114 = arith.addf %110, %113 : vector<8x1xf32>
    %115 = math.rsqrt %114 : vector<8x1xf32>
    %116 = vector.broadcast %115 : vector<8x1xf32> to vector<8x32xf32>
    %117 = arith.mulf %112, %116 : vector<8x32xf32>
    %118 = vector.broadcast %16 : vector<1x32xf32> to vector<8x32xf32>
    %119 = arith.mulf %117, %118 : vector<8x32xf32>
    %120 = vector.broadcast %17 : vector<1x32xf32> to vector<8x32xf32>
    %121 = arith.addf %119, %120 : vector<8x32xf32>
    %122 = vector.shape_cast %121 : vector<8x32xf32> to vector<1x8x32xf32>
    %123 = vector.broadcast %122 : vector<1x8x32xf32> to vector<4x8x32xf32>
    "tpu.trace_start"() <{level = 10 : i32, message = "hsd,hde->hse"}> : () -> ()
    %cst_65 = arith.constant dense<0.000000e+00> : vector<4x8x8xf32>
    %124 = tpu.matmul %123, %2, %cst_65 {dimension_numbers = #tpu.dot_dimension_numbers<[2], [1], [1], [2], [0, 0, 0, 1, 1, 2], [0], [0]>} : vector<4x8x32xf32>, vector<4x32x8xf32>, vector<4x8x8xf32> -> vector<4x8x8xf32>
    "tpu.trace_stop"() : () -> ()
    %125 = vector.broadcast %5 : vector<4x1x8xf32> to vector<4x8x8xf32>
    %126 = arith.addf %124, %125 : vector<4x8x8xf32>
    %cst_66 = arith.constant 0.353553385 : f32
    %127 = vector.broadcast %cst_66 : f32 to vector<4x8x8xf32>
    %128 = arith.mulf %126, %127 : vector<4x8x8xf32>
    "tpu.trace_start"() <{level = 10 : i32, message = "hsd,hde->hse"}> : () -> ()
    %cst_67 = arith.constant dense<0.000000e+00> : vector<4x8x8xf32>
    %129 = tpu.matmul %123, %3, %cst_67 {dimension_numbers = #tpu.dot_dimension_numbers<[2], [1], [1], [2], [0, 0, 0, 1, 1, 2], [0], [0]>} : vector<4x8x32xf32>, vector<4x32x8xf32>, vector<4x8x8xf32> -> vector<4x8x8xf32>
    "tpu.trace_stop"() : () -> ()
    %130 = vector.broadcast %6 : vector<4x1x8xf32> to vector<4x8x8xf32>
    %131 = arith.addf %129, %130 : vector<4x8x8xf32>
    "tpu.trace_start"() <{level = 10 : i32, message = "hsd,hde->hse"}> : () -> ()
    %cst_68 = arith.constant dense<0.000000e+00> : vector<4x8x8xf32>
    %132 = tpu.matmul %123, %4, %cst_68 {dimension_numbers = #tpu.dot_dimension_numbers<[2], [1], [1], [2], [0, 0, 0, 1, 1, 2], [0], [0]>} : vector<4x8x32xf32>, vector<4x32x8xf32>, vector<4x8x8xf32> -> vector<4x8x8xf32>
    "tpu.trace_stop"() : () -> ()
    %133 = vector.broadcast %7 : vector<4x1x8xf32> to vector<4x8x8xf32>
    %134 = arith.addf %132, %133 : vector<4x8x8xf32>
    "tpu.trace_start"() <{level = 10 : i32, message = "hqe,hke->hqk"}> : () -> ()
    %cst_69 = arith.constant dense<0.000000e+00> : vector<4x8x8xf32>
    %135 = tpu.matmul %128, %131, %cst_69 {dimension_numbers = #tpu.dot_dimension_numbers<[2], [2], [1], [1], [0, 0, 0, 1, 1, 1], [0], [0]>} : vector<4x8x8xf32>, vector<4x8x8xf32>, vector<4x8x8xf32> -> vector<4x8x8xf32>
    "tpu.trace_stop"() : () -> ()
    %cst_70 = arith.constant dense<0xFF800000> : vector<4x8xf32>
    %136 = vector.multi_reduction <maximumf>, %135, %cst_70 [2] : vector<4x8x8xf32> to vector<4x8xf32>
    %137 = vector.shape_cast %136 : vector<4x8xf32> to vector<4x8x1xf32>
    %138 = vector.broadcast %137 : vector<4x8x1xf32> to vector<4x8x8xf32>
    %139 = arith.subf %135, %138 : vector<4x8x8xf32>
    %140 = math.exp %139 : vector<4x8x8xf32>
    %cst_71 = arith.constant dense<0.000000e+00> : vector<4x8xf32>
    %141 = vector.multi_reduction <add>, %140, %cst_71 [2] : vector<4x8x8xf32> to vector<4x8xf32>
    %142 = vector.shape_cast %141 : vector<4x8xf32> to vector<4x8x1xf32>
    %143 = tpu.reciprocal %142 {approx = true} : vector<4x8x1xf32> -> vector<4x8x1xf32>
    %144 = vector.broadcast %143 : vector<4x8x1xf32> to vector<4x8x8xf32>
    %145 = arith.mulf %140, %144 : vector<4x8x8xf32>
    "tpu.trace_start"() <{level = 10 : i32, message = "hqk,hke->hqe"}> : () -> ()
    %cst_72 = arith.constant dense<0.000000e+00> : vector<4x8x8xf32>
    %146 = tpu.matmul %145, %134, %cst_72 {dimension_numbers = #tpu.dot_dimension_numbers<[2], [1], [1], [2], [0, 0, 0, 1, 1, 2], [0], [0]>} : vector<4x8x8xf32>, vector<4x8x8xf32>, vector<4x8x8xf32> -> vector<4x8x8xf32>
    "tpu.trace_stop"() : () -> ()
    %147 = vector.extract_strided_slice %146 {offsets = [0, 0, 0], sizes = [1, 8, 8], strides = [1, 1, 1]} : vector<4x8x8xf32> to vector<1x8x8xf32>
    %148 = vector.shape_cast %147 : vector<1x8x8xf32> to vector<8x8xf32>
    %149 = vector.extract_strided_slice %8 {offsets = [0, 0, 0], sizes = [1, 8, 32], strides = [1, 1, 1]} : vector<4x8x32xf32> to vector<1x8x32xf32>
    %150 = vector.shape_cast %149 : vector<1x8x32xf32> to vector<8x32xf32>
    %cst_73 = arith.constant dense<0.000000e+00> : vector<8x32xf32>
    %151 = tpu.matmul %148, %150, %cst_73 {dimension_numbers = #tpu.dot_dimension_numbers<[1], [0], [0], [1], [0, 0, 1, 1], [], []>} : vector<8x8xf32>, vector<8x32xf32>, vector<8x32xf32> -> vector<8x32xf32>
    %152 = vector.extract_strided_slice %146 {offsets = [1, 0, 0], sizes = [1, 8, 8], strides = [1, 1, 1]} : vector<4x8x8xf32> to vector<1x8x8xf32>
    %153 = vector.shape_cast %152 : vector<1x8x8xf32> to vector<8x8xf32>
    %154 = vector.extract_strided_slice %8 {offsets = [1, 0, 0], sizes = [1, 8, 32], strides = [1, 1, 1]} : vector<4x8x32xf32> to vector<1x8x32xf32>
    %155 = vector.shape_cast %154 : vector<1x8x32xf32> to vector<8x32xf32>
    %cst_74 = arith.constant dense<0.000000e+00> : vector<8x32xf32>
    %156 = tpu.matmul %153, %155, %cst_74 {dimension_numbers = #tpu.dot_dimension_numbers<[1], [0], [0], [1], [0, 0, 1, 1], [], []>} : vector<8x8xf32>, vector<8x32xf32>, vector<8x32xf32> -> vector<8x32xf32>
    %157 = arith.addf %151, %156 : vector<8x32xf32>
    %158 = vector.extract_strided_slice %146 {offsets = [2, 0, 0], sizes = [1, 8, 8], strides = [1, 1, 1]} : vector<4x8x8xf32> to vector<1x8x8xf32>
    %159 = vector.shape_cast %158 : vector<1x8x8xf32> to vector<8x8xf32>
    %160 = vector.extract_strided_slice %8 {offsets = [2, 0, 0], sizes = [1, 8, 32], strides = [1, 1, 1]} : vector<4x8x32xf32> to vector<1x8x32xf32>
    %161 = vector.shape_cast %160 : vector<1x8x32xf32> to vector<8x32xf32>
    %cst_75 = arith.constant dense<0.000000e+00> : vector<8x32xf32>
    %162 = tpu.matmul %159, %161, %cst_75 {dimension_numbers = #tpu.dot_dimension_numbers<[1], [0], [0], [1], [0, 0, 1, 1], [], []>} : vector<8x8xf32>, vector<8x32xf32>, vector<8x32xf32> -> vector<8x32xf32>
    %163 = arith.addf %157, %162 : vector<8x32xf32>
    %164 = vector.extract_strided_slice %146 {offsets = [3, 0, 0], sizes = [1, 8, 8], strides = [1, 1, 1]} : vector<4x8x8xf32> to vector<1x8x8xf32>
    %165 = vector.shape_cast %164 : vector<1x8x8xf32> to vector<8x8xf32>
    %166 = vector.extract_strided_slice %8 {offsets = [3, 0, 0], sizes = [1, 8, 32], strides = [1, 1, 1]} : vector<4x8x32xf32> to vector<1x8x32xf32>
    %167 = vector.shape_cast %166 : vector<1x8x32xf32> to vector<8x32xf32>
    %cst_76 = arith.constant dense<0.000000e+00> : vector<8x32xf32>
    %168 = tpu.matmul %165, %167, %cst_76 {dimension_numbers = #tpu.dot_dimension_numbers<[1], [0], [0], [1], [0, 0, 1, 1], [], []>} : vector<8x8xf32>, vector<8x32xf32>, vector<8x32xf32> -> vector<8x32xf32>
    %169 = arith.addf %163, %168 : vector<8x32xf32>
    %170 = vector.broadcast %9 : vector<1x32xf32> to vector<8x32xf32>
    %171 = arith.addf %169, %170 : vector<8x32xf32>
    %172 = arith.addf %121, %171 : vector<8x32xf32>
    %cst_77 = arith.constant dense<0.000000e+00> : vector<8xf32>
    %173 = vector.multi_reduction <add>, %172, %cst_77 [1] : vector<8x32xf32> to vector<8xf32>
    %174 = vector.shape_cast %173 : vector<8xf32> to vector<8x1xf32>
    %cst_78 = arith.constant 3.200000e+01 : f32
    %175 = vector.broadcast %cst_78 : f32 to vector<8x1xf32>
    %176 = arith.divf %174, %175 : vector<8x1xf32>
    %177 = vector.broadcast %176 : vector<8x1xf32> to vector<8x32xf32>
    %178 = arith.subf %172, %177 : vector<8x32xf32>
    %179 = arith.mulf %178, %178 : vector<8x32xf32>
    %cst_79 = arith.constant dense<0.000000e+00> : vector<8xf32>
    %180 = vector.multi_reduction <add>, %179, %cst_79 [1] : vector<8x32xf32> to vector<8xf32>
    %181 = vector.shape_cast %180 : vector<8xf32> to vector<8x1xf32>
    %cst_80 = arith.constant 3.200000e+01 : f32
    %182 = vector.broadcast %cst_80 : f32 to vector<8x1xf32>
    %183 = arith.divf %181, %182 : vector<8x1xf32>
    %184 = vector.broadcast %176 : vector<8x1xf32> to vector<8x32xf32>
    %185 = arith.subf %172, %184 : vector<8x32xf32>
    %cst_81 = arith.constant 9.99999974E-6 : f32
    %186 = vector.broadcast %cst_81 : f32 to vector<8x1xf32>
    %187 = arith.addf %183, %186 : vector<8x1xf32>
    %188 = math.rsqrt %187 : vector<8x1xf32>
    %189 = vector.broadcast %188 : vector<8x1xf32> to vector<8x32xf32>
    %190 = arith.mulf %185, %189 : vector<8x32xf32>
    %191 = vector.broadcast %10 : vector<1x32xf32> to vector<8x32xf32>
    %192 = arith.mulf %190, %191 : vector<8x32xf32>
    %193 = vector.broadcast %11 : vector<1x32xf32> to vector<8x32xf32>
    %194 = arith.addf %192, %193 : vector<8x32xf32>
    %cst_82 = arith.constant dense<0.000000e+00> : vector<8x64xf32>
    %195 = tpu.matmul %194, %12, %cst_82 {dimension_numbers = #tpu.dot_dimension_numbers<[1], [0], [0], [1], [0, 0, 1, 1], [], []>} : vector<8x32xf32>, vector<32x64xf32>, vector<8x64xf32> -> vector<8x64xf32>
    %196 = vector.broadcast %13 : vector<1x64xf32> to vector<8x64xf32>
    %197 = arith.addf %195, %196 : vector<8x64xf32>
    %cst_83 = arith.constant 0.000000e+00 : f32
    %198 = vector.broadcast %cst_83 : f32 to vector<8x64xf32>
    %199 = arith.maximumf %197, %198 : vector<8x64xf32>
    %cst_84 = arith.constant dense<0.000000e+00> : vector<8x32xf32>
    %200 = tpu.matmul %199, %14, %cst_84 {dimension_numbers = #tpu.dot_dimension_numbers<[1], [0], [0], [1], [0, 0, 1, 1], [], []>} : vector<8x64xf32>, vector<64x32xf32>, vector<8x32xf32> -> vector<8x32xf32>
    %201 = vector.broadcast %15 : vector<1x32xf32> to vector<8x32xf32>
    %202 = arith.addf %200, %201 : vector<8x32xf32>
    %203 = arith.addf %194, %202 : vector<8x32xf32>
    %cst_85 = arith.constant dense<0.000000e+00> : vector<8xf32>
    %204 = vector.multi_reduction <add>, %203, %cst_85 [1] : vector<8x32xf32> to vector<8xf32>
    %205 = vector.shape_cast %204 : vector<8xf32> to vector<8x1xf32>
    %cst_86 = arith.constant 3.200000e+01 : f32
    %206 = vector.broadcast %cst_86 : f32 to vector<8x1xf32>
    %207 = arith.divf %205, %206 : vector<8x1xf32>
    %208 = vector.broadcast %207 : vector<8x1xf32> to vector<8x32xf32>
    %209 = arith.subf %203, %208 : vector<8x32xf32>
    %210 = arith.mulf %209, %209 : vector<8x32xf32>
    %cst_87 = arith.constant dense<0.000000e+00> : vector<8xf32>
    %211 = vector.multi_reduction <add>, %210, %cst_87 [1] : vector<8x32xf32> to vector<8xf32>
    %212 = vector.shape_cast %211 : vector<8xf32> to vector<8x1xf32>
    %cst_88 = arith.constant 3.200000e+01 : f32
    %213 = vector.broadcast %cst_88 : f32 to vector<8x1xf32>
    %214 = arith.divf %212, %213 : vector<8x1xf32>
    %215 = vector.broadcast %207 : vector<8x1xf32> to vector<8x32xf32>
    %216 = arith.subf %203, %215 : vector<8x32xf32>
    %cst_89 = arith.constant 9.99999974E-6 : f32
    %217 = vector.broadcast %cst_89 : f32 to vector<8x1xf32>
    %218 = arith.addf %214, %217 : vector<8x1xf32>
    %219 = math.rsqrt %218 : vector<8x1xf32>
    %220 = vector.broadcast %219 : vector<8x1xf32> to vector<8x32xf32>
    %221 = arith.mulf %216, %220 : vector<8x32xf32>
    %222 = vector.broadcast %16 : vector<1x32xf32> to vector<8x32xf32>
    %223 = arith.mulf %221, %222 : vector<8x32xf32>
    %224 = vector.broadcast %17 : vector<1x32xf32> to vector<8x32xf32>
    %225 = arith.addf %223, %224 : vector<8x32xf32>
    %226 = vector.shape_cast %225 : vector<8x32xf32> to vector<1x8x32xf32>
    %227 = vector.broadcast %226 : vector<1x8x32xf32> to vector<4x8x32xf32>
    "tpu.trace_start"() <{level = 10 : i32, message = "hsd,hde->hse"}> : () -> ()
    %cst_90 = arith.constant dense<0.000000e+00> : vector<4x8x8xf32>
    %228 = tpu.matmul %227, %2, %cst_90 {dimension_numbers = #tpu.dot_dimension_numbers<[2], [1], [1], [2], [0, 0, 0, 1, 1, 2], [0], [0]>} : vector<4x8x32xf32>, vector<4x32x8xf32>, vector<4x8x8xf32> -> vector<4x8x8xf32>
    "tpu.trace_stop"() : () -> ()
    %229 = vector.broadcast %5 : vector<4x1x8xf32> to vector<4x8x8xf32>
    %230 = arith.addf %228, %229 : vector<4x8x8xf32>
    %cst_91 = arith.constant 0.353553385 : f32
    %231 = vector.broadcast %cst_91 : f32 to vector<4x8x8xf32>
    %232 = arith.mulf %230, %231 : vector<4x8x8xf32>
    "tpu.trace_start"() <{level = 10 : i32, message = "hsd,hde->hse"}> : () -> ()
    %cst_92 = arith.constant dense<0.000000e+00> : vector<4x8x8xf32>
    %233 = tpu.matmul %227, %3, %cst_92 {dimension_numbers = #tpu.dot_dimension_numbers<[2], [1], [1], [2], [0, 0, 0, 1, 1, 2], [0], [0]>} : vector<4x8x32xf32>, vector<4x32x8xf32>, vector<4x8x8xf32> -> vector<4x8x8xf32>
    "tpu.trace_stop"() : () -> ()
    %234 = vector.broadcast %6 : vector<4x1x8xf32> to vector<4x8x8xf32>
    %235 = arith.addf %233, %234 : vector<4x8x8xf32>
    "tpu.trace_start"() <{level = 10 : i32, message = "hsd,hde->hse"}> : () -> ()
    %cst_93 = arith.constant dense<0.000000e+00> : vector<4x8x8xf32>
    %236 = tpu.matmul %227, %4, %cst_93 {dimension_numbers = #tpu.dot_dimension_numbers<[2], [1], [1], [2], [0, 0, 0, 1, 1, 2], [0], [0]>} : vector<4x8x32xf32>, vector<4x32x8xf32>, vector<4x8x8xf32> -> vector<4x8x8xf32>
    "tpu.trace_stop"() : () -> ()
    %237 = vector.broadcast %7 : vector<4x1x8xf32> to vector<4x8x8xf32>
    %238 = arith.addf %236, %237 : vector<4x8x8xf32>
    "tpu.trace_start"() <{level = 10 : i32, message = "hqe,hke->hqk"}> : () -> ()
    %cst_94 = arith.constant dense<0.000000e+00> : vector<4x8x8xf32>
    %239 = tpu.matmul %232, %235, %cst_94 {dimension_numbers = #tpu.dot_dimension_numbers<[2], [2], [1], [1], [0, 0, 0, 1, 1, 1], [0], [0]>} : vector<4x8x8xf32>, vector<4x8x8xf32>, vector<4x8x8xf32> -> vector<4x8x8xf32>
    "tpu.trace_stop"() : () -> ()
    %cst_95 = arith.constant dense<0xFF800000> : vector<4x8xf32>
    %240 = vector.multi_reduction <maximumf>, %239, %cst_95 [2] : vector<4x8x8xf32> to vector<4x8xf32>
    %241 = vector.shape_cast %240 : vector<4x8xf32> to vector<4x8x1xf32>
    %242 = vector.broadcast %241 : vector<4x8x1xf32> to vector<4x8x8xf32>
    %243 = arith.subf %239, %242 : vector<4x8x8xf32>
    %244 = math.exp %243 : vector<4x8x8xf32>
    %cst_96 = arith.constant dense<0.000000e+00> : vector<4x8xf32>
    %245 = vector.multi_reduction <add>, %244, %cst_96 [2] : vector<4x8x8xf32> to vector<4x8xf32>
    %246 = vector.shape_cast %245 : vector<4x8xf32> to vector<4x8x1xf32>
    %247 = tpu.reciprocal %246 {approx = true} : vector<4x8x1xf32> -> vector<4x8x1xf32>
    %248 = vector.broadcast %247 : vector<4x8x1xf32> to vector<4x8x8xf32>
    %249 = arith.mulf %244, %248 : vector<4x8x8xf32>
    "tpu.trace_start"() <{level = 10 : i32, message = "hqk,hke->hqe"}> : () -> ()
    %cst_97 = arith.constant dense<0.000000e+00> : vector<4x8x8xf32>
    %250 = tpu.matmul %249, %238, %cst_97 {dimension_numbers = #tpu.dot_dimension_numbers<[2], [1], [1], [2], [0, 0, 0, 1, 1, 2], [0], [0]>} : vector<4x8x8xf32>, vector<4x8x8xf32>, vector<4x8x8xf32> -> vector<4x8x8xf32>
    "tpu.trace_stop"() : () -> ()
    %251 = vector.extract_strided_slice %250 {offsets = [0, 0, 0], sizes = [1, 8, 8], strides = [1, 1, 1]} : vector<4x8x8xf32> to vector<1x8x8xf32>
    %252 = vector.shape_cast %251 : vector<1x8x8xf32> to vector<8x8xf32>
    %253 = vector.extract_strided_slice %8 {offsets = [0, 0, 0], sizes = [1, 8, 32], strides = [1, 1, 1]} : vector<4x8x32xf32> to vector<1x8x32xf32>
    %254 = vector.shape_cast %253 : vector<1x8x32xf32> to vector<8x32xf32>
    %cst_98 = arith.constant dense<0.000000e+00> : vector<8x32xf32>
    %255 = tpu.matmul %252, %254, %cst_98 {dimension_numbers = #tpu.dot_dimension_numbers<[1], [0], [0], [1], [0, 0, 1, 1], [], []>} : vector<8x8xf32>, vector<8x32xf32>, vector<8x32xf32> -> vector<8x32xf32>
    %256 = vector.extract_strided_slice %250 {offsets = [1, 0, 0], sizes = [1, 8, 8], strides = [1, 1, 1]} : vector<4x8x8xf32> to vector<1x8x8xf32>
    %257 = vector.shape_cast %256 : vector<1x8x8xf32> to vector<8x8xf32>
    %258 = vector.extract_strided_slice %8 {offsets = [1, 0, 0], sizes = [1, 8, 32], strides = [1, 1, 1]} : vector<4x8x32xf32> to vector<1x8x32xf32>
    %259 = vector.shape_cast %258 : vector<1x8x32xf32> to vector<8x32xf32>
    %cst_99 = arith.constant dense<0.000000e+00> : vector<8x32xf32>
    %260 = tpu.matmul %257, %259, %cst_99 {dimension_numbers = #tpu.dot_dimension_numbers<[1], [0], [0], [1], [0, 0, 1, 1], [], []>} : vector<8x8xf32>, vector<8x32xf32>, vector<8x32xf32> -> vector<8x32xf32>
    %261 = arith.addf %255, %260 : vector<8x32xf32>
    %262 = vector.extract_strided_slice %250 {offsets = [2, 0, 0], sizes = [1, 8, 8], strides = [1, 1, 1]} : vector<4x8x8xf32> to vector<1x8x8xf32>
    %263 = vector.shape_cast %262 : vector<1x8x8xf32> to vector<8x8xf32>
    %264 = vector.extract_strided_slice %8 {offsets = [2, 0, 0], sizes = [1, 8, 32], strides = [1, 1, 1]} : vector<4x8x32xf32> to vector<1x8x32xf32>
    %265 = vector.shape_cast %264 : vector<1x8x32xf32> to vector<8x32xf32>
    %cst_100 = arith.constant dense<0.000000e+00> : vector<8x32xf32>
    %266 = tpu.matmul %263, %265, %cst_100 {dimension_numbers = #tpu.dot_dimension_numbers<[1], [0], [0], [1], [0, 0, 1, 1], [], []>} : vector<8x8xf32>, vector<8x32xf32>, vector<8x32xf32> -> vector<8x32xf32>
    %267 = arith.addf %261, %266 : vector<8x32xf32>
    %268 = vector.extract_strided_slice %250 {offsets = [3, 0, 0], sizes = [1, 8, 8], strides = [1, 1, 1]} : vector<4x8x8xf32> to vector<1x8x8xf32>
    %269 = vector.shape_cast %268 : vector<1x8x8xf32> to vector<8x8xf32>
    %270 = vector.extract_strided_slice %8 {offsets = [3, 0, 0], sizes = [1, 8, 32], strides = [1, 1, 1]} : vector<4x8x32xf32> to vector<1x8x32xf32>
    %271 = vector.shape_cast %270 : vector<1x8x32xf32> to vector<8x32xf32>
    %cst_101 = arith.constant dense<0.000000e+00> : vector<8x32xf32>
    %272 = tpu.matmul %269, %271, %cst_101 {dimension_numbers = #tpu.dot_dimension_numbers<[1], [0], [0], [1], [0, 0, 1, 1], [], []>} : vector<8x8xf32>, vector<8x32xf32>, vector<8x32xf32> -> vector<8x32xf32>
    %273 = arith.addf %267, %272 : vector<8x32xf32>
    %274 = vector.broadcast %9 : vector<1x32xf32> to vector<8x32xf32>
    %275 = arith.addf %273, %274 : vector<8x32xf32>
    %276 = arith.addf %225, %275 : vector<8x32xf32>
    %cst_102 = arith.constant dense<0.000000e+00> : vector<8xf32>
    %277 = vector.multi_reduction <add>, %276, %cst_102 [1] : vector<8x32xf32> to vector<8xf32>
    %278 = vector.shape_cast %277 : vector<8xf32> to vector<8x1xf32>
    %cst_103 = arith.constant 3.200000e+01 : f32
    %279 = vector.broadcast %cst_103 : f32 to vector<8x1xf32>
    %280 = arith.divf %278, %279 : vector<8x1xf32>
    %281 = vector.broadcast %280 : vector<8x1xf32> to vector<8x32xf32>
    %282 = arith.subf %276, %281 : vector<8x32xf32>
    %283 = arith.mulf %282, %282 : vector<8x32xf32>
    %cst_104 = arith.constant dense<0.000000e+00> : vector<8xf32>
    %284 = vector.multi_reduction <add>, %283, %cst_104 [1] : vector<8x32xf32> to vector<8xf32>
    %285 = vector.shape_cast %284 : vector<8xf32> to vector<8x1xf32>
    %cst_105 = arith.constant 3.200000e+01 : f32
    %286 = vector.broadcast %cst_105 : f32 to vector<8x1xf32>
    %287 = arith.divf %285, %286 : vector<8x1xf32>
    %288 = vector.broadcast %280 : vector<8x1xf32> to vector<8x32xf32>
    %289 = arith.subf %276, %288 : vector<8x32xf32>
    %cst_106 = arith.constant 9.99999974E-6 : f32
    %290 = vector.broadcast %cst_106 : f32 to vector<8x1xf32>
    %291 = arith.addf %287, %290 : vector<8x1xf32>
    %292 = math.rsqrt %291 : vector<8x1xf32>
    %293 = vector.broadcast %292 : vector<8x1xf32> to vector<8x32xf32>
    %294 = arith.mulf %289, %293 : vector<8x32xf32>
    %295 = vector.broadcast %10 : vector<1x32xf32> to vector<8x32xf32>
    %296 = arith.mulf %294, %295 : vector<8x32xf32>
    %297 = vector.broadcast %11 : vector<1x32xf32> to vector<8x32xf32>
    %298 = arith.addf %296, %297 : vector<8x32xf32>
    %cst_107 = arith.constant dense<0.000000e+00> : vector<8x64xf32>
    %299 = tpu.matmul %298, %12, %cst_107 {dimension_numbers = #tpu.dot_dimension_numbers<[1], [0], [0], [1], [0, 0, 1, 1], [], []>} : vector<8x32xf32>, vector<32x64xf32>, vector<8x64xf32> -> vector<8x64xf32>
    %300 = vector.broadcast %13 : vector<1x64xf32> to vector<8x64xf32>
    %301 = arith.addf %299, %300 : vector<8x64xf32>
    %cst_108 = arith.constant 0.000000e+00 : f32
    %302 = vector.broadcast %cst_108 : f32 to vector<8x64xf32>
    %303 = arith.maximumf %301, %302 : vector<8x64xf32>
    %cst_109 = arith.constant dense<0.000000e+00> : vector<8x32xf32>
    %304 = tpu.matmul %303, %14, %cst_109 {dimension_numbers = #tpu.dot_dimension_numbers<[1], [0], [0], [1], [0, 0, 1, 1], [], []>} : vector<8x64xf32>, vector<64x32xf32>, vector<8x32xf32> -> vector<8x32xf32>
    %305 = vector.broadcast %15 : vector<1x32xf32> to vector<8x32xf32>
    %306 = arith.addf %304, %305 : vector<8x32xf32>
    %307 = arith.addf %298, %306 : vector<8x32xf32>
    %cst_110 = arith.constant dense<0.000000e+00> : vector<8xf32>
    %308 = vector.multi_reduction <add>, %307, %cst_110 [1] : vector<8x32xf32> to vector<8xf32>
    %309 = vector.shape_cast %308 : vector<8xf32> to vector<8x1xf32>
    %cst_111 = arith.constant 3.200000e+01 : f32
    %310 = vector.broadcast %cst_111 : f32 to vector<8x1xf32>
    %311 = arith.divf %309, %310 : vector<8x1xf32>
    %312 = vector.broadcast %311 : vector<8x1xf32> to vector<8x32xf32>
    %313 = arith.subf %307, %312 : vector<8x32xf32>
    %314 = arith.mulf %313, %313 : vector<8x32xf32>
    %cst_112 = arith.constant dense<0.000000e+00> : vector<8xf32>
    %315 = vector.multi_reduction <add>, %314, %cst_112 [1] : vector<8x32xf32> to vector<8xf32>
    %316 = vector.shape_cast %315 : vector<8xf32> to vector<8x1xf32>
    %cst_113 = arith.constant 3.200000e+01 : f32
    %317 = vector.broadcast %cst_113 : f32 to vector<8x1xf32>
    %318 = arith.divf %316, %317 : vector<8x1xf32>
    %319 = vector.broadcast %311 : vector<8x1xf32> to vector<8x32xf32>
    %320 = arith.subf %307, %319 : vector<8x32xf32>
    %cst_114 = arith.constant 9.99999974E-6 : f32
    %321 = vector.broadcast %cst_114 : f32 to vector<8x1xf32>
    %322 = arith.addf %318, %321 : vector<8x1xf32>
    %323 = math.rsqrt %322 : vector<8x1xf32>
    %324 = vector.broadcast %323 : vector<8x1xf32> to vector<8x32xf32>
    %325 = arith.mulf %320, %324 : vector<8x32xf32>
    %326 = vector.broadcast %16 : vector<1x32xf32> to vector<8x32xf32>
    %327 = arith.mulf %325, %326 : vector<8x32xf32>
    %328 = vector.broadcast %17 : vector<1x32xf32> to vector<8x32xf32>
    %329 = arith.addf %327, %328 : vector<8x32xf32>
    %c0_115 = arith.constant 0 : index
    %c0_116 = arith.constant 0 : index
    %c0_117 = arith.constant 0 : index
    %330 = vector.load %arg18[%c0_115, %c0_116, %c0_117] : memref<1x8x32xf32, #tpu.memory_space<vmem>>, vector<1x8x32xf32>
    %331 = vector.shape_cast %330 : vector<1x8x32xf32> to vector<8x32xf32>
    %332 = vector.shape_cast %329 : vector<8x32xf32> to vector<1x8x32xf32>
    tpu.vector_store %arg18[%c0_115, %c0_116, %c0_117], %332 {strides = array<i32>} : memref<1x8x32xf32, #tpu.memory_space<vmem>>, vector<1x8x32xf32>,
    return
  }
  func.func @transform_0(%arg0: i32) -> (i32, i32, i32) {
    %c0_i32 = arith.constant 0 : i32
    %c0_i32_0 = arith.constant 0 : i32
    %c0_i32_1 = arith.constant 0 : i32
    return %arg0, %c0_i32, %c0_i32_0 : i32, i32, i32
  }
  func.func @transform_1(%arg0: i32) -> (i32, i32, i32) {
    %c0_i32 = arith.constant 0 : i32
    %c0_i32_0 = arith.constant 0 : i32
    %c0_i32_1 = arith.constant 0 : i32
    %c0_i32_2 = arith.constant 0 : i32
    return %c0_i32, %c0_i32_0, %c0_i32_1 : i32, i32, i32
  }
  func.func @transform_2(%arg0: i32) -> (i32, i32, i32) {
    %c0_i32 = arith.constant 0 : i32
    %c0_i32_0 = arith.constant 0 : i32
    %c0_i32_1 = arith.constant 0 : i32
    %c0_i32_2 = arith.constant 0 : i32
    return %c0_i32, %c0_i32_0, %c0_i32_1 : i32, i32, i32
  }
  func.func @transform_3(%arg0: i32) -> (i32, i32, i32) {
    %c0_i32 = arith.constant 0 : i32
    %c0_i32_0 = arith.constant 0 : i32
    %c0_i32_1 = arith.constant 0 : i32
    %c0_i32_2 = arith.constant 0 : i32
    return %c0_i32, %c0_i32_0, %c0_i32_1 : i32, i32, i32
  }
  func.func @transform_4(%arg0: i32) -> (i32, i32, i32) {
    %c0_i32 = arith.constant 0 : i32
    %c0_i32_0 = arith.constant 0 : i32
    %c0_i32_1 = arith.constant 0 : i32
    %c0_i32_2 = arith.constant 0 : i32
    return %c0_i32, %c0_i32_0, %c0_i32_1 : i32, i32, i32
  }
  func.func @transform_5(%arg0: i32) -> (i32, i32, i32) {
    %c0_i32 = arith.constant 0 : i32
    %c0_i32_0 = arith.constant 0 : i32
    %c0_i32_1 = arith.constant 0 : i32
    %c0_i32_2 = arith.constant 0 : i32
    return %c0_i32, %c0_i32_0, %c0_i32_1 : i32, i32, i32
  }
  func.func @transform_6(%arg0: i32) -> (i32, i32, i32) {
    %c0_i32 = arith.constant 0 : i32
    %c0_i32_0 = arith.constant 0 : i32
    %c0_i32_1 = arith.constant 0 : i32
    %c0_i32_2 = arith.constant 0 : i32
    return %c0_i32, %c0_i32_0, %c0_i32_1 : i32, i32, i32
  }
  func.func @transform_7(%arg0: i32) -> (i32, i32, i32) {
    %c0_i32 = arith.constant 0 : i32
    %c0_i32_0 = arith.constant 0 : i32
    %c0_i32_1 = arith.constant 0 : i32
    %c0_i32_2 = arith.constant 0 : i32
    return %c0_i32, %c0_i32_0, %c0_i32_1 : i32, i32, i32
  }
  func.func @transform_8(%arg0: i32) -> (i32, i32) {
    %c0_i32 = arith.constant 0 : i32
    %c0_i32_0 = arith.constant 0 : i32
    %c0_i32_1 = arith.constant 0 : i32
    return %c0_i32, %c0_i32_0 : i32, i32
  }
  func.func @transform_9(%arg0: i32) -> (i32, i32) {
    %c0_i32 = arith.constant 0 : i32
    %c0_i32_0 = arith.constant 0 : i32
    %c0_i32_1 = arith.constant 0 : i32
    return %c0_i32, %c0_i32_0 : i32, i32
  }
  func.func @transform_10(%arg0: i32) -> (i32, i32) {
    %c0_i32 = arith.constant 0 : i32
    %c0_i32_0 = arith.constant 0 : i32
    %c0_i32_1 = arith.constant 0 : i32
    return %c0_i32, %c0_i32_0 : i32, i32
  }
  func.func @transform_11(%arg0: i32) -> (i32, i32) {
    %c0_i32 = arith.constant 0 : i32
    %c0_i32_0 = arith.constant 0 : i32
    %c0_i32_1 = arith.constant 0 : i32
    return %c0_i32, %c0_i32_0 : i32, i32
  }
  func.func @transform_12(%arg0: i32) -> (i32, i32) {
    %c0_i32 = arith.constant 0 : i32
    %c0_i32_0 = arith.constant 0 : i32
    %c0_i32_1 = arith.constant 0 : i32
    return %c0_i32, %c0_i32_0 : i32, i32
  }
  func.func @transform_13(%arg0: i32) -> (i32, i32) {
    %c0_i32 = arith.constant 0 : i32
    %c0_i32_0 = arith.constant 0 : i32
    %c0_i32_1 = arith.constant 0 : i32
    return %c0_i32, %c0_i32_0 : i32, i32
  }
  func.func @transform_14(%arg0: i32) -> (i32, i32) {
    %c0_i32 = arith.constant 0 : i32
    %c0_i32_0 = arith.constant 0 : i32
    %c0_i32_1 = arith.constant 0 : i32
    return %c0_i32, %c0_i32_0 : i32, i32
  }
  func.func @transform_15(%arg0: i32) -> (i32, i32) {
    %c0_i32 = arith.constant 0 : i32
    %c0_i32_0 = arith.constant 0 : i32
    %c0_i32_1 = arith.constant 0 : i32
    return %c0_i32, %c0_i32_0 : i32, i32
  }
  func.func @transform_16(%arg0: i32) -> (i32, i32) {
    %c0_i32 = arith.constant 0 : i32
    %c0_i32_0 = arith.constant 0 : i32
    %c0_i32_1 = arith.constant 0 : i32
    return %c0_i32, %c0_i32_0 : i32, i32
  }
  func.func @transform_17(%arg0: i32) -> (i32, i32, i32) {
    %c0_i32 = arith.constant 0 : i32
    %c0_i32_0 = arith.constant 0 : i32
    %c0_i32_1 = arith.constant 0 : i32
    return %arg0, %c0_i32, %c0_i32_0 : i32, i32, i32
  }
}

</mosaic_0001>

<bundles_post_ra>
// kernel: encoder_forward.1
= control target key start
LH: loop header
LB: loop body
LE: loop exit
PB: predicated region body
PF: predicated region fallthrough
CT: control target
= control target key end

     0   :  { %s8014_s24 = smov 0   ;;  %s9430_s0 = inlined_call_operand.vmem [shape: f32[2,8,32], index: 0, kind: input, shape index: {}]   ;;  %s9431_s1 = inlined_call_operand.vmem [shape: f32[4,32,8], index: 1, kind: input, shape index: {}]   ;;  %s9432_s2 = inlined_call_operand.vmem [shape: f32[4,32,8], index: 2, kind: input, shape index: {}]   ;;  %s9433_s3 = inlined_call_operand.vmem [shape: f32[4,32,8], index: 3, kind: input, shape index: {}]   ;;  %s9434_s4 = inlined_call_operand.vmem [shape: f32[4,1,8], index: 4, kind: input, shape index: {}]   ;;  %s9435_s5 = inlined_call_operand.vmem [shape: f32[4,1,8], index: 5, kind: input, shape index: {}]   ;;  %s9436_s6 = inlined_call_operand.vmem [shape: f32[4,1,8], index: 6, kind: input, shape index: {}]   ;;  %s9437_s7 = inlined_call_operand.vmem [shape: f32[4,8,32], index: 7, kind: input, shape index: {}]   ;;  %s9438_s8 = inlined_call_operand.vmem [shape: f32[1,32], index: 8, kind: input, shape index: {}]   ;;  %s9439_s9 = inlined_call_operand.vmem [shape: f32[1,32], index: 9, kind: input, shape index: {}]   ;;  %s9440_s10 = inlined_call_operand.vmem [shape: f32[1,32], index: 10, kind: input, shape index: {}]   ;;  %s9441_s11 = inlined_call_operand.vmem [shape: f32[32,64], index: 11, kind: input, shape index: {}]   ;;  %s9442_s12 = inlined_call_operand.vmem [shape: f32[1,64], index: 12, kind: input, shape index: {}]   ;;  %s9443_s13 = inlined_call_operand.vmem [shape: f32[64,32], index: 13, kind: input, shape index: {}]   ;;  %s9444_s14 = inlined_call_operand.vmem [shape: f32[1,32], index: 14, kind: input, shape index: {}]   ;;  %s9445_s15 = inlined_call_operand.vmem [shape: f32[1,32], index: 15, kind: input, shape index: {}]   ;;  %s9446_s16 = inlined_call_operand.vmem [shape: f32[1,32], index: 16, kind: input, shape index: {}]   ;;  %s9447_s17 = inlined_call_operand.vmem [shape: f32[2,8,32], index: 17, kind: output, shape index: {}]  }
   0x1   :  { %9476 = sst [smem:[#allocation27_spill]] %s9430_s0 }
   0x2   :  { %9477 = sst [smem:[#allocation28_spill]] %s9431_s1 }
   0x3 LB: > { %s6683_s25 = sadd.s32 4294967295, %s7920_s24   ;;  %p6687_p0 = scmp.ge.s32.totalorder %s7920_s24, 1  ;;  %s7920_s24 = sphi %s8014_s24, %s27_s24  }
   0x4   : > { %p486_p1 = scmp.lt.s32.totalorder %s7920_s24, 3 }
   0x6   : > { %p487_p2 = pnand %p6687_p0, %p486_p1 }
   0x8   : > { %490 = sbr.rel (%p487_p2) target bundleno = 6455 (0x1937), region = 88 }
   0xd   : > { %s9478_s28 = sld [smem:[#allocation28_spill]]  ;;  %p536_p3 = scmp.lt.s32.totalorder %s6683_s25, 1  ;;  %v9449_v2 = vmov 0.0   ;;  %vm652_vm0 = vcmask 261120   ;;  %vm7923_vm1 = vmmov 0   ;;  %v8159_v18 = vld [vmem:[%s9432_s2 + $0x18] sm:$0xff] }
   0xe   : > { %7095 = vmatprep.subr.mxu0 %v9449_v2  ;;  %7106 = vmatprep.subr.mxu1 %v9449_v2  ;;  %s9479_s18 = sld [smem:[#allocation27_spill]]  ;;  %v8164_v19 = vld [vmem:[%s9432_s2 + $0x38] sm:$0xff]  ;;  %v8175_v20 = vld [vmem:[%s9432_s2 + $0x10] sm:$0xff]  ;;  %v8189_v22 = vld [vmem:[%s9432_s2 + $0x8] sm:$0xff]  ;;  %vm1548_vm2 = vcmask 64512   ;;  %vm2605_vm3 = vcmask 523264  }
   0xf   : > { %s9532_s25 = smov (!%p536_p3, %s6683_s25), 1  ;;  %7103 = vmatprep.mubr.msk.f32.mxu0 %vm7923_vm1, %v9449_v2  ;;  %7114 = vmatprep.mubr.msk.f32.mxu1 %vm7923_vm1, %v9449_v2  ;;  %v8180_v21 = vld [vmem:[%s9432_s2 + $0x30] sm:$0xff]  ;;  %v8194_v23 = vld [vmem:[%s9432_s2 + $0x28] sm:$0xff]  ;;  %v8203_v24 = vld [vmem:[%s9432_s2] sm:$0xff] }
  0x10   : > { %s6688_s26 = sshll.u32 %s9532_s25, 3  ;;  %v8210_v25 = vld [vmem:[%s9432_s2 + $0x20] sm:$0xff]  ;;  %v8223_v26 = vld [vmem:[%s9432_s2 + $0x58] sm:$0xff]  ;;  %v8239_v28 = vld [vmem:[%s9432_s2 + $0x50] sm:$0xff] }
  0x11   : > { %v8228_v27 = vld [vmem:[%s9432_s2 + $0x78] sm:$0xff]  ;;  %v8244_v29 = vld [vmem:[%s9432_s2 + $0x70] sm:$0xff]  ;;  %v8253_v30 = vld [vmem:[%s9432_s2 + $0x48] sm:$0xff] }
  0x12   : > { %v8258_v31 = vld [vmem:[%s9432_s2 + $0x68] sm:$0xff]  ;;  %v8267_v32 = vld [vmem:[%s9432_s2 + $0x40] sm:$0xff]  ;;  %v8297_v34 = vld [vmem:[%s9433_s3 + $0x18] sm:$0xff] }
  0x13   : > { %v8025_v0 = vld [vmem:[%s9478_s28 + $0x18] sm:$0xff]  ;;  %v8037_v3 = vld [vmem:[%s9478_s28 + $0x10] sm:$0xff]  ;;  %v8053_v5 = vld [vmem:[%s9478_s28 + $0x8] sm:$0xff] }
  0x14   : > { %v8030_v1 = vld [vmem:[%s9478_s28 + $0x38] sm:$0xff]  ;;  %v8042_v4 = vld [vmem:[%s9478_s28 + $0x30] sm:$0xff]  ;;  %7096 = vmatpush3.msra.mxu0 %v8025_v0  ;;  %v8058_v6 = vld [vmem:[%s9478_s28 + $0x28] sm:$0xff]  ;;  %s539_s19 = scalar_lea.vmem %s9479_s18, %s6688_s26 }
  0x15   : > { %7107 = vmatpush3.msra.mxu1 %v8030_v1  ;;  %7097 = vmatprep.subr.mxu0 %v9449_v2  ;;  %v8068_v7 = vld [vmem:[%s9478_s28] sm:$0xff]  ;;  %v8095_v10 = vld [vmem:[%s9478_s28 + $0x58] sm:$0xff]  ;;  %v8111_v12 = vld [vmem:[%s9478_s28 + $0x50] sm:$0xff] }
  0x16   : > { %7108 = vmatprep.subr.mxu1 %v9449_v2  ;;  %7098 = vmatpush3.msra.mxu0 %v8037_v3  ;;  %v8080_v8 = vld [vmem:[%s9478_s28 + $0x20] sm:$0xff]  ;;  %v8100_v11 = vld [vmem:[%s9478_s28 + $0x78] sm:$0xff]  ;;  %v8116_v13 = vld [vmem:[%s9478_s28 + $0x70] sm:$0xff] }
  0x17   : > { %7109 = vmatpush3.msra.mxu1 %v8042_v4  ;;  %7099 = vmatprep.subr.mxu0 %v9449_v2  ;;  %v8082_v9 = vld [vmem:[%s539_s19] sm:$0xff]  ;;  %v8125_v14 = vld [vmem:[%s9478_s28 + $0x48] sm:$0xff]  ;;  %v8304_v35 = vld [vmem:[%s9433_s3 + $0x10] sm:$0xff]  ;;  %s543_s19 = scalar_lea.vmem %s9447_s17, %s6688_s26 }
  0x18   : > { %7110 = vmatprep.subr.mxu1 %v9449_v2  ;;  %7100 = vmatpush3.msra.mxu0 %v8053_v5  ;;  %v8130_v15 = vld [vmem:[%s9478_s28 + $0x68] sm:$0xff]  ;;  %v8139_v16 = vld [vmem:[%s9478_s28 + $0x40] sm:$0xff]  ;;  %v8329_v38 = vld [vmem:[%s9433_s3 + $0x58] sm:$0xff] }
  0x19   : > { %7111 = vmatpush3.msra.mxu1 %v8058_v6  ;;  %7101 = vmatprep.subr.mxu0 %v9449_v2  ;;  %v8146_v17 = vld [vmem:[%s9478_s28 + $0x60] sm:$0xff]  ;;  %v8309_v36 = vld [vmem:[%s9433_s3 + $0x8] sm:$0xff]  ;;  %v8336_v39 = vld [vmem:[%s9433_s3 + $0x38] sm:$0xff] }
  0x1a   : > { %7112 = vmatprep.subr.mxu1 %v9449_v2  ;;  %7102 = vmatpush3.msra.mxu0 %v8068_v7  ;;  %v8274_v33 = vld [vmem:[%s9432_s2 + $0x60] sm:$0xff]  ;;  %v8341_v40 = vld [vmem:[%s9433_s3 + $0x50] sm:$0xff]  ;;  %v8353_v42 = vld [vmem:[%s9433_s3 + $0x48] sm:$0xff] }
  0x1b   : > { %7113 = vmatpush3.msra.mxu1 %v8080_v8  ;;  %7104 = vmatmul.mubr.msk.f32.vlgmr.msra.gmra.mxu0 %vm652_vm0, %v8082_v9  ;;  %v8316_v37 = vld [vmem:[%s9433_s3] sm:$0xff]  ;;  %v8346_v41 = vld [vmem:[%s9433_s3 + $0x30] sm:$0xff]  ;;  %v8360_v43 = vld [vmem:[%s9433_s3 + $0x28] sm:$0xff] }
  0x1c   : > { %7117 = vmatprep.subr.mxu0 %v9449_v2  ;;  %7128 = vmatprep.subr.mxu1 %v9449_v2  ;;  %9480 = vst [vmem:[#allocation2_spill] sm:$0xff] %v8346_v41  ;;  %9481 = vst [vmem:[#allocation3_spill] sm:$0xff] %v8360_v43  ;;  %v8365_v44 = vld [vmem:[%s9433_s3 + $0x40] sm:$0xff]  ;;  %v8389_v46 = vld [vmem:[%s9433_s3 + $0x78] sm:$0xff] }
  0x1d   : > { %7115 = vmatmul.mubr.msk.f32.vlgmr.msra.gmra.mxu1 %vm652_vm0, %v8082_v9  ;;  %7118 = vmatpush3.msra.mxu0 %v8095_v10  ;;  %v8379_v45 = vld [vmem:[%s9433_s3 + $0x20] sm:$0xff]  ;;  %9483 = vst [vmem:[#allocation5_spill] sm:$0xff] %v8389_v46  ;;  %v8395_v47 = vld [vmem:[%s9433_s3 + $0x70] sm:$0xff]  ;;  %v8406_v48 = vld [vmem:[%s9433_s3 + $0x68] sm:$0xff] }
  0x1e   : > { %7129 = vmatpush3.msra.mxu1 %v8100_v11  ;;  %7119 = vmatprep.subr.mxu0 %v9449_v2  ;;  %9482 = vst [vmem:[#allocation4_spill] sm:$0xff] %v8379_v45  ;;  %9484 = vst [vmem:[#allocation6_spill] sm:$0xff] %v8395_v47  ;;  %v8414_v49 = vld [vmem:[%s9433_s3 + $0x60] sm:$0xff] }
  0x1f   : > { %7130 = vmatprep.subr.mxu1 %v9449_v2  ;;  %7120 = vmatpush3.msra.mxu0 %v8111_v12  ;;  %9485 = vst [vmem:[#allocation7_spill] sm:$0xff] %v8406_v48  ;;  %9486 = vst [vmem:[#allocation8_spill] sm:$0xff] %v8414_v49  ;;  %v8425_v58 = vld [vmem:[%s9434_s4] ss:$0 sm:$0xff]  ;;  %v8436_v62 = vld [vmem:[%s9435_s5 + $0x1] ss:$0 sm:$0xff] }
  0x20   : > { %7131 = vmatpush3.msra.mxu1 %v8116_v13  ;;  %7121 = vmatprep.subr.mxu0 %v9449_v2  ;;  %9487 = vst [vmem:[#allocation9_spill] sm:$0xff] %v8425_v58  ;;  %v8430_v59 = vld [vmem:[%s9435_s5] ss:$0 sm:$0xff]  ;;  %9489 = vst [vmem:[#allocation11_spill] sm:$0xff] %v8436_v62  ;;  %v8441_v63 = vld [vmem:[%s9434_s4 + $0x1] ss:$0 sm:$0xff] }
  0x21   : > { %7132 = vmatprep.subr.mxu1 %v9449_v2  ;;  %7122 = vmatpush3.msra.mxu0 %v8125_v14  ;;  %9488 = vst [vmem:[#allocation10_spill] sm:$0xff] %v8430_v59  ;;  %9490 = vst [vmem:[#allocation12_spill] sm:$0xff] %v8441_v63 }
  0x22   : > { %7133 = vmatpush3.msra.mxu1 %v8130_v15  ;;  %7123 = vmatprep.subr.mxu0 %v9449_v2 }
  0x23   : > { %7134 = vmatprep.subr.mxu1 %v9449_v2  ;;  %7124 = vmatpush3.msra.mxu0 %v8139_v16 }
  0x24   : > { %7125 = vmatprep.mubr.msk.f32.mxu0 %vm7923_vm1, %v9449_v2  ;;  %7135 = vmatpush3.msra.mxu1 %v8146_v17 }
  0x25   : > { %7126 = vmatmul.mubr.msk.f32.vlgmr.msra.gmra.mxu0 %vm652_vm0, %v8082_v9  ;;  %7136 = vmatprep.mubr.msk.f32.mxu1 %vm7923_vm1, %v9449_v2 }
  0x26   : > { %7139 = vmatprep.subr.mxu0 %v9449_v2  ;;  %7150 = vmatprep.subr.mxu1 %v9449_v2 }
  0x27   : > { %7137 = vmatmul.mubr.msk.f32.vlgmr.msra.gmra.mxu1 %vm652_vm0, %v8082_v9  ;;  %7140 = vmatpush3.msra.mxu0 %v8159_v18 }
  0x28   : > { %7151 = vmatpush3.msra.mxu1 %v8164_v19  ;;  %7141 = vmatprep.subr.mxu0 %v9449_v2 }
  0x29   : > { %7152 = vmatprep.subr.mxu1 %v9449_v2  ;;  %7142 = vmatpush3.msra.mxu0 %v8175_v20 }
  0x2a   : > { %7153 = vmatpush3.msra.mxu1 %v8180_v21  ;;  %7143 = vmatprep.subr.mxu0 %v9449_v2 }
  0x2b   : > { %7154 = vmatprep.subr.mxu1 %v9449_v2  ;;  %7144 = vmatpush3.msra.mxu0 %v8189_v22 }
  0x2c   : > { %7155 = vmatpush3.msra.mxu1 %v8194_v23  ;;  %7145 = vmatprep.subr.mxu0 %v9449_v2 }
  0x2d   : > { %7156 = vmatprep.subr.mxu1 %v9449_v2  ;;  %7146 = vmatpush3.msra.mxu0 %v8203_v24 }
  0x2e   : > { %7147 = vmatprep.mubr.msk.f32.mxu0 %vm7923_vm1, %v9449_v2  ;;  %7157 = vmatpush3.msra.mxu1 %v8210_v25 }
  0x2f   : > { %7148 = vmatmul.mubr.msk.f32.vlgmr.msra.gmra.mxu0 %vm652_vm0, %v8082_v9  ;;  %7158 = vmatprep.mubr.msk.f32.mxu1 %vm7923_vm1, %v9449_v2 }
  0x30   : > { %7161 = vmatprep.subr.mxu0 %v9449_v2  ;;  %7172 = vmatprep.subr.mxu1 %v9449_v2 }
  0x31   : > { %7159 = vmatmul.mubr.msk.f32.vlgmr.msra.gmra.mxu1 %vm652_vm0, %v8082_v9  ;;  %7162 = vmatpush3.msra.mxu0 %v8223_v26 }
  0x32   : > { %7173 = vmatpush3.msra.mxu1 %v8228_v27  ;;  %7163 = vmatprep.subr.mxu0 %v9449_v2 }
  0x33   : > { %7174 = vmatprep.subr.mxu1 %v9449_v2  ;;  %7164 = vmatpush3.msra.mxu0 %v8239_v28 }
  0x34   : > { %7175 = vmatpush3.msra.mxu1 %v8244_v29  ;;  %7165 = vmatprep.subr.mxu0 %v9449_v2 }
  0x35   : > { %7176 = vmatprep.subr.mxu1 %v9449_v2  ;;  %7166 = vmatpush3.msra.mxu0 %v8253_v30 }
  0x36   : > { %7177 = vmatpush3.msra.mxu1 %v8258_v31  ;;  %7167 = vmatprep.subr.mxu0 %v9449_v2 }
  0x37   : > { %7178 = vmatprep.subr.mxu1 %v9449_v2  ;;  %7168 = vmatpush3.msra.mxu0 %v8267_v32 }
  0x38   : > { %7169 = vmatprep.mubr.msk.f32.mxu0 %vm7923_vm1, %v9449_v2  ;;  %7179 = vmatpush3.msra.mxu1 %v8274_v33 }
  0x39   : > { %7180 = vmatprep.mubr.msk.f32.mxu1 %vm7923_vm1, %v9449_v2  ;;  %7170 = vmatmul.mubr.msk.f32.vlgmr.msra.gmra.mxu0 %vm652_vm0, %v8082_v9 }
  0x3a   : > { %7181 = vmatmul.mubr.msk.f32.vlgmr.msra.gmra.mxu1 %vm652_vm0, %v8082_v9  ;;  %7183 = vmatprep.subr.mxu0 %v9449_v2 }
  0x3b   : > { %7191 = vmatprep.mubr.msk.f32.mxu0 %vm7923_vm1, %v9449_v2  ;;  %7194 = vmatprep.subr.mxu1 %v9449_v2 }
  0x3c   : > { %7202 = vmatprep.mubr.msk.f32.mxu1 %vm7923_vm1, %v9449_v2  ;;  %7184 = vmatpush3.msra.mxu0 %v8297_v34 }
  0x3d   : > { %7185 = vmatprep.subr.mxu0 %v9449_v2  ;;  %7195 = vmatpush3.msra.mxu1 %v8336_v39 }
  0x3e   : > { %7186 = vmatpush3.msra.mxu0 %v8304_v35  ;;  %7196 = vmatprep.subr.mxu1 %v9449_v2 }
  0x3f   : > { %7187 = vmatprep.subr.mxu0 %v9449_v2  ;;  %7197 = vmatpush3.msra.mxu1 %v8346_v41 }
  0x40   : > { %7188 = vmatpush3.msra.mxu0 %v8309_v36  ;;  %7198 = vmatprep.subr.mxu1 %v9449_v2 }
  0x41   : > { %7189 = vmatprep.subr.mxu0 %v9449_v2  ;;  %7199 = vmatpush3.msra.mxu1 %v8360_v43 }
  0x42   : > { %7190 = vmatpush3.msra.mxu0 %v8316_v37  ;;  %7200 = vmatprep.subr.mxu1 %v9449_v2 }
  0x43   : > { %7205 = vmatprep.subr.mxu0 %v9449_v2  ;;  %7192 = vmatmul.mubr.msk.f32.vlgmr.msra.gmra.mxu0 %vm652_vm0, %v8082_v9 }
  0x44   : > { %7213 = vmatprep.mubr.msk.f32.mxu0 %vm7923_vm1, %v9449_v2  ;;  %7206 = vmatpush3.msra.mxu0 %v8329_v38 }
  0x45   : > { %7207 = vmatprep.subr.mxu0 %v9449_v2  ;;  %7201 = vmatpush3.msra.mxu1 %v8379_v45 }
  0x46   : > { %7208 = vmatpush3.msra.mxu0 %v8341_v40  ;;  %7216 = vmatprep.subr.mxu1 %v9449_v2 }
  0x47   : > { %7209 = vmatprep.subr.mxu0 %v9449_v2  ;;  %7203 = vmatmul.mubr.msk.f32.vlgmr.msra.gmra.mxu1 %vm652_vm0, %v8082_v9 }
  0x48   : > { %7210 = vmatpush3.msra.mxu0 %v8353_v42  ;;  %7217 = vmatpush3.msra.mxu1 %v8389_v46 }
  0x49   : > { %7211 = vmatprep.subr.mxu0 %v9449_v2  ;;  %7218 = vmatprep.subr.mxu1 %v9449_v2 }
  0x4a   : > { %7212 = vmatpush3.msra.mxu0 %v8365_v44  ;;  %7224 = vmatprep.mubr.msk.f32.mxu1 %vm7923_vm1, %v9449_v2 }
  0x4b   : > { %7214 = vmatmul.mubr.msk.f32.vlgmr.msra.gmra.mxu0 %vm652_vm0, %v8082_v9  ;;  %7227 = vmatprep.subr.mxu0 %v9449_v2 }
  0x4c   : > { %7229 = vmatprep.mubr.msk.f32.mxu0 %vm7923_vm1, %v9449_v2  ;;  %7219 = vmatpush3.msra.mxu1 %v8395_v47 }
  0x4d   : > { %7220 = vmatprep.subr.mxu1 %v9449_v2 }
  0x4e   : > { %7221 = vmatpush3.msra.mxu1 %v8406_v48 }
  0x4f   : > { %7222 = vmatprep.subr.mxu1 %v9449_v2 }
  0x50   : > { %7223 = vmatpush3.msra.mxu1 %v8414_v49  ;;  %v9491_v49 = vmov 0.0  }
  0x51   : > { %7225 = vmatmul.mubr.msk.f32.vlgmr.msra.gmra.mxu1 %vm652_vm0, %v8082_v9  ;;  %7242 = vmatprep.subr.mxu1 %v9449_v2 }
  0x52   : > { %7244 = vmatprep.mubr.msk.f32.mxu1 %vm7923_vm1, %v9449_v2 }
  0xdb   : > { %v722_v50 = vpop.f32.mrf.mxu0 }
  0xdc   : > { %v723_v60 = vadd.f32 %v8425_v58, %v722_v50 }
  0xdd   : > { %v7105_v51 = vpop.f32.mrf.mxu0  ;;  %v792_v52 = vpop.f32.mrf.mxu1 }
  0xde   : > { %v936_v50 = vmul.f32 0.35355338, %v723_v60  ;;  %v793_v2 = vadd.f32 %v8441_v63, %v792_v52  ;;  %v8460_v52 = vld [vmem:[%s9434_s4 + $0x3] ss:$0 sm:$0xff] }
  0xdf   : > { %v7116_v53 = vpop.f32.mrf.mxu1  ;;  %9493 = vst [vmem:[#allocation14_spill] sm:$0xff] %v8460_v52 }
  0xe5   : > { %v862_v54 = vpop.f32.mrf.mxu0 }
  0xe7   : > { %v7127_v55 = vpop.f32.mrf.mxu0  ;;  %v932_v56 = vpop.f32.mrf.mxu1 }
  0xe9   : > { %v7138_v57 = vpop.f32.mrf.mxu1 }
  0xef   : > { %v1030_v61 = vpop.f32.mrf.mxu0 }
  0xf0   : > { %v1031_v51 = vadd.f32 %v8430_v59, %v1030_v61  ;;  %v937_v61 = vmul.f32 0.35355338, %v793_v2  ;;  %v8471_v2 = vld [vmem:[%s9435_s5 + $0x3] ss:$0 sm:$0xff] }
  0xf1   : > { %v7149_v53 = vpop.f32.mrf.mxu0  ;;  %v1100_v55 = vpop.f32.mrf.mxu1  ;;  %9495 = vst [vmem:[#allocation16_spill] sm:$0xff] %v8471_v2 }
  0xf2   : > { %v1101_v57 = vadd.f32 %v8436_v62, %v1100_v55  ;;  %7228 = vmatpush3.xpose.msk.msra.mxu0 %vm1548_vm2, %v1031_v51  ;;  %v8455_v53 = vld [vmem:[%s9434_s4 + $0x2] ss:$0 sm:$0xff]  ;;  %v933_v51 = vadd.f32 %v8460_v52, %v932_v56 }
  0xf3   : > { %v7160_v58 = vpop.f32.mrf.mxu1  ;;  %7232 = vmatprep.subr.mxu0 %v9491_v49  ;;  %9492 = vst [vmem:[#allocation13_spill] sm:$0xff] %v8455_v53  ;;  %v863_v60 = vadd.f32 %v8455_v53, %v862_v54  ;;  %v8493_v54 = vld [vmem:[%s9436_s6] ss:$0 sm:$0xff] }
  0xf4   : > { %v8466_v58 = vld [vmem:[%s9435_s5 + $0x2] ss:$0 sm:$0xff]  ;;  %v939_v48 = vmul.f32 0.35355338, %v933_v51  ;;  %9496 = vst [vmem:[#allocation17_spill] sm:$0xff] %v8493_v54 }
  0xf5   : > { %7230 = vmatmul.mubr.msk.f32.vlgmr.msra.gmra.mxu0 %vm1548_vm2, %v936_v50  ;;  %9494 = vst [vmem:[#allocation15_spill] sm:$0xff] %v8466_v58 }
  0xf6   : > { %7233 = vmatpush3.xpose.msk.msra.mxu0 %vm1548_vm2, %v1101_v57  ;;  %7234 = vmatprep.mubr.msk.f32.mxu0 %vm7923_vm1, %v9491_v49 }
  0xf7   : > { %7237 = vmatprep.subr.mxu0 %v9491_v49 }
  0xf9   : > { %7235 = vmatmul.mubr.msk.f32.vlgmr.msra.gmra.mxu0 %vm1548_vm2, %v937_v61  ;;  %v1170_v55 = vpop.f32.mrf.mxu0  ;;  %v938_v61 = vmul.f32 0.35355338, %v863_v60 }
  0xfa   : > { %v1240_v57 = vpop.f32.mrf.mxu1  ;;  %7239 = vmatprep.mubr.msk.f32.mxu0 %vm7923_vm1, %v9491_v49  ;;  %v1171_v50 = vadd.f32 %v8466_v58, %v1170_v55 }
  0xfb   : > { %v1241_v62 = vadd.f32 %v8471_v2, %v1240_v57  ;;  %v7171_v63 = vpop.f32.mrf.mxu0 }
  0xfc   : > { %v7182_v59 = vpop.f32.mrf.mxu1  ;;  %7238 = vmatpush3.xpose.msk.msra.mxu0 %vm1548_vm2, %v1171_v50 }
  0xfd   : > { %7243 = vmatpush3.xpose.msk.msra.mxu1 %vm1548_vm2, %v1241_v62  ;;  %7247 = vmatprep.subr.mxu0 %v9491_v49 }
  0xfe   : > { %7252 = vmatprep.subr.mxu1 %v9491_v49 }
  0xff   : > { %7240 = vmatmul.mubr.msk.f32.vlgmr.msra.gmra.mxu0 %vm1548_vm2, %v938_v61 }
 0x100   : > { %7245 = vmatmul.mubr.msk.f32.vlgmr.msra.gmra.mxu1 %vm1548_vm2, %v939_v48  ;;  %7249 = vmatprep.mubr.msk.f32.mxu0 %vm7923_vm1, %v9491_v49  ;;  %v8502_v48 = vld [vmem:[%s9436_s6 + $0x1] ss:$0 sm:$0xff] }
 0x101   : > { %7254 = vmatprep.mubr.msk.f32.mxu1 %vm7923_vm1, %v9491_v49  ;;  %9497 = vst [vmem:[#allocation18_spill] sm:$0xff] %v8502_v48 }
 0x103   : > { %v1334_v56 = vpop.f32.mrf.mxu0 }
 0x104   : > { %v1335_v59 = vadd.f32 %v8493_v54, %v1334_v56 }
 0x105   : > { %v7193_v62 = vpop.f32.mrf.mxu0 }
 0x106   : > { %7248 = vmatpush3.msra.mxu0 %v1335_v59 }
 0x107   : > { %7257 = vmatprep.subr.mxu0 %v9491_v49  ;;  %v1404_v51 = vpop.f32.mrf.mxu1 }
 0x108   : > { %v1405_v55 = vadd.f32 %v8502_v48, %v1404_v51 }
 0x109   : > { %v7204_v57 = vpop.f32.mrf.mxu1 }
 0x10a   : > { %7253 = vmatpush3.msra.mxu1 %v1405_v55 }
 0x10b   : > { %v8497_v63 = vpop.f32.mrf.mxu0  ;;  %7262 = vmatprep.subr.mxu1 %v9491_v49 }
 0x10d   : > { %v7215_v60 = vpop.f32.mrf.mxu0 }
 0x111   : > { %v8506_v50 = vpop.f32.mrf.mxu1 }
 0x113   : > { %v7226_v61 = vpop.f32.mrf.mxu1 }
 0x1b5   : > { %v1621_v56 = vpop.f32.mrf.mxu0 }
 0x1b6   : > { %v1853_v59 = vsel %vm1548_vm2, %v1621_v56, -inf }
 0x1b7   : > { %1854 = vmax.xlane.f32.xlu0 %v1853_v59  ;;  %v7231_v62 = vpop.f32.mrf.mxu0 }
 0x1b9   : > { %v1697_v2 = vpop.f32.mrf.mxu0 }
 0x1ba   : > { %v1856_v52 = vsel %vm1548_vm2, %v1697_v2, -inf }
 0x1bb   : > { %1857 = vmax.xlane.f32.xlu0 %v1856_v52  ;;  %v7236_v60 = vpop.f32.mrf.mxu0 }
 0x1bf   : > { %v1773_v54 = vpop.f32.mrf.mxu0 }
 0x1c0   : > { %v1849_v58 = vpop.f32.mrf.mxu1  ;;  %v1859_v51 = vsel %vm1548_vm2, %v1773_v54, -inf }
 0x1c1   : > { %1860 = vmax.xlane.f32.xlu1 %v1859_v51  ;;  %v7241_v57 = vpop.f32.mrf.mxu0  ;;  %v1862_v48 = vsel %vm1548_vm2, %v1849_v58, -inf }
 0x1c2   : > { %v7246_v55 = vpop.f32.mrf.mxu1 }
 0x1c5   : > { %1863 = vmax.xlane.f32.xlu1 %v1862_v48 }
 0x240   : > { %v1855_v61 = vpop.xlane.xlu0 %1854 }
 0x241   : > { %v1865_v53 = vsub.f32 %v1621_v56, %v1855_v61 }
 0x243   : > { %v1869_v47 = vmul.f32 1.442695, %v1865_v53 }
 0x244   : > { %v1858_v59 = vpop.xlane.xlu0 %1857 }
 0x245   : > { %7771 = vpow2.f32 %v1869_v47  ;;  %v1866_v62 = vsub.f32 %v1697_v2, %v1858_v59 }
 0x247   : > { %v1871_v46 = vmul.f32 1.442695, %v1866_v62 }
 0x249   : > { %7773 = vpow2.f32 %v1871_v46 }
 0x24a   : > { %v1861_v52 = vpop.xlane.xlu1 %1860 }
 0x24b   : > { %v1867_v60 = vsub.f32 %v1773_v54, %v1861_v52  ;;  %v8526_v52 = vld [vmem:[%s9436_s6 + $0x3] ss:$0 sm:$0xff] }
 0x24d   : > { %v1873_v45 = vmul.f32 1.442695, %v1867_v60 }
 0x24e   : > { %v1864_v43 = vpop.xlane.xlu1 %1863 }
 0x24f   : > { %7775 = vpow2.f32 %v1873_v45  ;;  %v1868_v41 = vsub.f32 %v1849_v58, %v1864_v43  ;;  %v8519_v58 = vld [vmem:[%s9436_s6 + $0x2] ss:$0 sm:$0xff] }
 0x250   : > { %v1475_v62 = vadd.f32 %v8519_v58, %v8497_v63 }
 0x251   : > { %v1875_v51 = vmul.f32 1.442695, %v1868_v41 }
 0x252   : > { %v7772_v55 = vpop.eup %7771 }
 0x253   : > { %v1877_v57 = vsel %vm1548_vm2, %v7772_v55, 0.0  ;;  %7777 = vpow2.f32 %v1875_v51 }
 0x254   : > { %1878 = vadd.xlane.f32.xlu0 %v1877_v57 }
 0x256   : > { %v7774_v48 = vpop.eup %7773 }
 0x257   : > { %v1880_v53 = vsel %vm1548_vm2, %v7774_v48, 0.0 }
 0x258   : > { %1881 = vadd.xlane.f32.xlu1 %v1880_v53 }
 0x25c   : > { %v7776_v47 = vpop.eup %7775 }
 0x25d   : > { %v1883_v2 = vsel %vm1548_vm2, %v7776_v47, 0.0 }
 0x25e   : > { %1884 = vadd.xlane.f32.xlu0 %v1883_v2  ;;  %v8561_v2 = vld [vmem:[%s9437_s7 + $0x18] sm:$0xff] }
 0x260   : > { %v7778_v46 = vpop.eup %7777 }
 0x261   : > { %v1886_v54 = vsel %vm1548_vm2, %v7778_v46, 0.0 }
 0x262   : > { %1887 = vadd.xlane.f32.xlu1 %v1886_v54 }
 0x2dd   : > { %v1879_v45 = vpop.xlane.xlu0 %1878 }
 0x2de   : > { %7779 = vrcp.f32 %v1879_v45  ;;  %v8570_v45 = vld [vmem:[%s9437_s7 + $0x10] sm:$0xff] }
 0x2e1   : > { %v1882_v43 = vpop.xlane.xlu1 %1881 }
 0x2e2   : > { %7781 = vrcp.f32 %v1882_v43 }
 0x2e7   : > { %v1885_v41 = vpop.xlane.xlu0 %1884 }
 0x2e8   : > { %7783 = vrcp.f32 %v1885_v41 }
 0x2eb   : > { %v7780_v56 = vpop.eup %7779  ;;  %v1888_v61 = vpop.xlane.xlu1 %1887 }
 0x2ec   : > { %v1893_v59 = vmul.f32 %v7780_v56, %v7772_v55  ;;  %7785 = vrcp.f32 %v1888_v61  ;;  %v1545_v55 = vadd.f32 %v8526_v52, %v8506_v50  ;;  %v8547_v50 = vld [vmem:[%s9437_s7] sm:$0xff] }
 0x2ee   : > { %7250 = vmatmul.mubr.msk.f32.vlgmr.msra.gmra.mxu0 %vm1548_vm2, %v1893_v59 }
 0x2ef   : > { %v7782_v60 = vpop.eup %7781  ;;  %7258 = vmatpush3.msra.mxu0 %v1475_v62  ;;  %7259 = vmatprep.mubr.msk.f32.mxu0 %vm7923_vm1, %v9491_v49 }
 0x2f0   : > { %v1894_v51 = vmul.f32 %v7782_v60, %v7774_v48  ;;  %7267 = vmatprep.subr.mxu0 %v9491_v49 }
 0x2f2   : > { %7255 = vmatmul.mubr.msk.f32.vlgmr.msra.gmra.mxu1 %vm1548_vm2, %v1894_v51 }
 0x2f3   : > { %7263 = vmatpush3.msra.mxu1 %v1545_v55  ;;  %7264 = vmatprep.mubr.msk.f32.mxu1 %vm7923_vm1, %v9491_v49 }
 0x2f4   : > { %7272 = vmatprep.subr.mxu1 %v9491_v49 }
 0x2f5   : > { %v7784_v63 = vpop.eup %7783 }
 0x2f6   : > { %v1895_v57 = vmul.f32 %v7784_v63, %v7776_v47  ;;  %v8554_v47 = vld [vmem:[%s9437_s7 + $0x8] sm:$0xff] }
 0x2f8   : > { %7260 = vmatmul.mubr.msk.f32.vlgmr.msra.gmra.mxu0 %vm1548_vm2, %v1895_v57 }
 0x2f9   : > { %v7786_v53 = vpop.eup %7785  ;;  %7269 = vmatprep.mubr.msk.f32.mxu0 %vm7923_vm1, %v9491_v49  ;;  %7268 = vmatpush3.msra.mxu0 %v8554_v47 }
 0x2fa   : > { %v1896_v48 = vmul.f32 %v7786_v53, %v7778_v46  ;;  %7277 = vmatprep.subr.mxu0 %v9491_v49 }
 0x2fc   : > { %7265 = vmatmul.mubr.msk.f32.vlgmr.msra.gmra.mxu1 %vm1548_vm2, %v1896_v48 }
 0x2fd   : > { %7274 = vmatprep.mubr.msk.f32.mxu1 %vm7923_vm1, %v9491_v49  ;;  %7273 = vmatpush3.msra.mxu1 %v8547_v50 }
 0x2fe   : > { %7282 = vmatprep.subr.mxu1 %v9491_v49 }
 0x3ae   : > { %v1966_v46 = vpop.f32.mrf.mxu0 }
 0x3af   : > { %7275 = vmatmul.mubr.msk.f32.vlgmr.msra.gmra.mxu1 %vm1548_vm2, %v1966_v46 }
 0x3b0   : > { %v7251_v54 = vpop.f32.mrf.mxu0  ;;  %7283 = vmatpush3.msra.mxu1 %v8561_v2  ;;  %7284 = vmatprep.mubr.msk.f32.mxu1 %vm7923_vm1, %v9491_v49 }
 0x3b1   : > { %7298 = vmatprep.subr.mxu1 %v9491_v49  ;;  %v8587_v54 = vld [vmem:[%s9438_s8] ss:$0 sm:$0xff] }
 0x3b2   : > { %v2039_v43 = vpop.f32.mrf.mxu1  ;;  %9498 = vst [vmem:[#allocation19_spill] sm:$0xff] %v8587_v54 }
 0x3b3   : > { %7270 = vmatmul.mubr.msk.f32.vlgmr.msra.gmra.mxu0 %vm1548_vm2, %v2039_v43 }
 0x3b4   : > { %v7256_v41 = vpop.f32.mrf.mxu1  ;;  %7278 = vmatpush3.msra.mxu0 %v8570_v45  ;;  %7279 = vmatprep.mubr.msk.f32.mxu0 %vm7923_vm1, %v9491_v49 }
 0x3b5   : > { %7287 = vmatprep.subr.mxu0 %v9491_v49 }
 0x3b8   : > { %v2112_v56 = vpop.f32.mrf.mxu0 }
 0x3b9   : > { %7280 = vmatmul.mubr.msk.f32.vlgmr.msra.gmra.mxu0 %vm1548_vm2, %v2112_v56 }
 0x3ba   : > { %v7261_v61 = vpop.f32.mrf.mxu0  ;;  %7295 = vmatprep.mubr.msk.f32.mxu0 %vm7923_vm1, %v9491_v49 }
 0x3bc   : > { %v2185_v59 = vpop.f32.mrf.mxu1 }
 0x3bd   : > { %7285 = vmatmul.mubr.msk.f32.vlgmr.msra.gmra.mxu1 %vm1548_vm2, %v2185_v59 }
 0x3be   : > { %v7266_v62 = vpop.f32.mrf.mxu1  ;;  %7314 = vmatprep.mubr.msk.f32.mxu1 %vm7923_vm1, %v9491_v49 }
 0x46f   : > { %v2331_v60 = vpop.f32.mrf.mxu1 }
 0x471   : > { %v7276_v51 = vpop.f32.mrf.mxu1 }
 0x473   : > { %v2258_v55 = vpop.f32.mrf.mxu0 }
 0x474   : > { %v2332_v53 = vadd.f32 %v2331_v60, %v2258_v55 }
 0x475   : > { %v7271_v63 = vpop.f32.mrf.mxu0 }
 0x479   : > { %v2404_v57 = vpop.f32.mrf.mxu0 }
 0x47a   : > { %v2408_v46 = vadd.f32 %v2404_v57, %v2332_v53  ;;  %v8596_v53 = vld [vmem:[%s9441_s11 + $0x18] sm:$0xff] }
 0x47b   : > { %v7281_v48 = vpop.f32.mrf.mxu0  ;;  %7288 = vmatpush3.msra.mxu0 %v8596_v53 }
 0x47c   : > { %7289 = vmatprep.subr.mxu0 %v9491_v49  ;;  %v8608_v48 = vld [vmem:[%s9441_s11 + $0x8] sm:$0xff] }
 0x47d   : > { %v2478_v43 = vpop.f32.mrf.mxu1 }
 0x47e   : > { %v2482_v41 = vadd.f32 %v2478_v43, %v2408_v46  ;;  %v8615_v46 = vld [vmem:[%s9441_s11] sm:$0xff]  ;;  %v8623_v43 = vld [vmem:[%s9443_s13 + $0x38] sm:$0xff] }
 0x47f   : > { %v7286_v56 = vpop.f32.mrf.mxu1  ;;  %7299 = vmatpush3.msra.mxu1 %v8623_v43 }
 0x480   : > { %v2489_v61 = vadd.f32 %v8587_v54, %v2482_v41  ;;  %v8628_v41 = vld [vmem:[%s9443_s13 + $0x30] sm:$0xff]  ;;  %7300 = vmatprep.subr.mxu1 %v9491_v49  ;;  %v8636_v56 = vld [vmem:[%s9443_s13 + $0x28] sm:$0xff] }
 0x481   : > { %9499 = vst [vmem:[#allocation20_spill] sm:$0xff] %v8636_v56  ;;  %7301 = vmatpush3.msra.mxu1 %v8628_v41 }
 0x482   : > { %v2490_v59 = vadd.f32 %v2489_v61, %v8082_v9  ;;  %v8603_v9 = vld [vmem:[%s9441_s11 + $0x10] sm:$0xff]  ;;  %7302 = vmatprep.subr.mxu1 %v9491_v49  ;;  %v8643_v61 = vld [vmem:[%s9443_s13 + $0x20] sm:$0xff] }
 0x483   : > { %7290 = vmatpush3.msra.mxu0 %v8603_v9  ;;  %9500 = vst [vmem:[#allocation21_spill] sm:$0xff] %v8643_v61  ;;  %7303 = vmatpush3.msra.mxu1 %v8636_v56 }
 0x484   : > { %v2491_v62 = vsel %vm652_vm0, %v2490_v59, 0.0  ;;  %7291 = vmatprep.subr.mxu0 %v9491_v49  ;;  %7304 = vmatprep.subr.mxu1 %v9491_v49 }
 0x485   : > { %2492 = vadd.xlane.f32.xlu0 %v2491_v62  ;;  %7292 = vmatpush3.msra.mxu0 %v8608_v48 }
 0x486   : > { %7293 = vmatprep.subr.mxu0 %v9491_v49  ;;  %7305 = vmatpush3.msra.mxu1 %v8643_v61  ;;  %v8664_v61 = vld [vmem:[%s9440_s10] ss:$0 sm:$0xff] }
 0x487   : > { %7294 = vmatpush3.msra.mxu0 %v8615_v46  ;;  %7306 = vmatprep.subr.mxu1 %v9491_v49  ;;  %9503 = vst [vmem:[#allocation24_spill] sm:$0xff] %v8664_v61 }
 0x488   : > { %7317 = vmatprep.subr.mxu0 %v9491_v49 }
 0x50e   : > { %v2493_v51 = vpop.xlane.xlu0 %2492 }
 0x50f   : > { %v2495_v63 = vmul.f32 0.03125, %v2493_v51 }
 0x511   : > { %v2496_v60 = vsub.f32 %v2490_v59, %v2495_v63  ;;  %v8650_v59 = vld [vmem:[%s9443_s13 + $0x18] sm:$0xff] }
 0x512   : > { %9501 = vst [vmem:[#allocation22_spill] sm:$0xff] %v8650_v59  ;;  %7307 = vmatpush3.msra.mxu1 %v8650_v59 }
 0x513   : > { %v2497_v55 = vmul.f32 %v2496_v60, %v2496_v60  ;;  %7308 = vmatprep.subr.mxu1 %v9491_v49 }
 0x515   : > { %v2498_v57 = vsel %vm652_vm0, %v2497_v55, 0.0 }
 0x516   : > { %2499 = vadd.xlane.f32.xlu1 %v2498_v57  ;;  %v8659_v57 = vld [vmem:[%s9439_s9] ss:$0 sm:$0xff] }
 0x517   : > { %9502 = vst [vmem:[#allocation23_spill] sm:$0xff] %v8659_v57 }
 0x59f   : > { %v2500_v62 = vpop.xlane.xlu1 %2499 }
 0x5a0   : > { %v2501_v51 = vmul.f32 0.03125, %v2500_v62 }
 0x5a2   : > { %v2502_v63 = vadd.f32 1e-05, %v2501_v51 }
 0x5a4   : > { %7787 = vrsqrt.f32 %v2502_v63 }
 0x5b1   : > { %v7788_v55 = vpop.eup %7787 }
 0x5b2   : > { %v2504_v54 = vmul.f32 %v7788_v55, %v2496_v60 }
 0x5b4   : > { %v2511_v59 = vmul.f32 %v8659_v57, %v2504_v54 }
 0x5b6   : > { %v2518_v56 = vadd.f32 %v8664_v61, %v2511_v59 }
 0x5b8   : > { %7296 = vmatmul.mubr.msk.f32.vlgmr.msra.gmra.mxu0 %vm652_vm0, %v2518_v56 }
 0x5b9   : > { %7318 = vmatpush3.msra.mxu0 %v8025_v0  ;;  %7325 = vmatprep.mubr.msk.f32.mxu0 %vm7923_vm1, %v9491_v49  ;;  %v8682_v0 = vld [vmem:[%s9443_s13 + $0x10] sm:$0xff] }
 0x5ba   : > { %7319 = vmatprep.subr.mxu0 %v9491_v49  ;;  %7309 = vmatpush3.msra.mxu1 %v8682_v0 }
 0x5bb   : > { %7320 = vmatpush3.msra.mxu0 %v8037_v3  ;;  %7310 = vmatprep.subr.mxu1 %v9491_v49  ;;  %v8689_v3 = vld [vmem:[%s9443_s13 + $0x8] sm:$0xff] }
 0x5bc   : > { %7321 = vmatprep.subr.mxu0 %v9491_v49  ;;  %7311 = vmatpush3.msra.mxu1 %v8689_v3 }
 0x5bd   : > { %7322 = vmatpush3.msra.mxu0 %v8053_v5  ;;  %7312 = vmatprep.subr.mxu1 %v9491_v49  ;;  %v8696_v5 = vld [vmem:[%s9443_s13] sm:$0xff] }
 0x5be   : > { %7323 = vmatprep.subr.mxu0 %v9491_v49  ;;  %9504 = vst [vmem:[#allocation25_spill] sm:$0xff] %v8696_v5  ;;  %7313 = vmatpush3.msra.mxu1 %v8696_v5 }
 0x5bf   : > { %7324 = vmatpush3.msra.mxu0 %v8068_v7  ;;  %7339 = vmatprep.subr.mxu1 %v9491_v49  ;;  %v8703_v7 = vld [vmem:[%s9442_s12] ss:$0 sm:$0xff] }
 0x5c0   : > { %7328 = vmatprep.subr.mxu0 %v9491_v49  ;;  %9505 = vst [vmem:[#allocation26_spill] sm:$0xff] %v8703_v7 }
 0x678   : > { %v2594_v54 = vpop.f32.mrf.mxu0 }
 0x679   : > { %v2595_v60 = vadd.f32 %v8703_v7, %v2594_v54 }
 0x67a   : > { %v7297_v59 = vpop.f32.mrf.mxu0 }
 0x67b   : > { %v2598_v62 = vmax.f32 %v2595_v60, 0.0 }
 0x67d   : > { %7315 = vmatmul.mubr.msk.f32.vlgmr.msra.gmra.mxu1 %vm2605_vm3, %v2598_v62 }
 0x67e   : > { %7340 = vmatpush3.msra.mxu1 %v8095_v10  ;;  %7347 = vmatprep.mubr.msk.f32.mxu1 %vm7923_vm1, %v9491_v49  ;;  %v8720_v10 = vld [vmem:[%s9444_s14] ss:$0 sm:$0xff] }
 0x67f   : > { %7341 = vmatprep.subr.mxu1 %v9491_v49 }
 0x680   : > { %7342 = vmatpush3.msra.mxu1 %v8111_v12 }
 0x681   : > { %7343 = vmatprep.subr.mxu1 %v9491_v49 }
 0x682   : > { %7344 = vmatpush3.msra.mxu1 %v8125_v14 }
 0x683   : > { %7345 = vmatprep.subr.mxu1 %v9491_v49 }
 0x684   : > { %7346 = vmatpush3.msra.mxu1 %v8139_v16 }
 0x685   : > { %7361 = vmatprep.subr.mxu1 %v9491_v49 }
 0x73d   : > { %v2675_v51 = vpop.f32.mrf.mxu1 }
 0x73e   : > { %v2676_v63 = vadd.f32 %v8720_v10, %v2675_v51  ;;  %v8728_v51 = vld [vmem:[%s9445_s15] ss:$0 sm:$0xff] }
 0x73f   : > { %v7316_v55 = vpop.f32.mrf.mxu1 }
 0x740   : > { %v2679_v12 = vadd.f32 %v2676_v63, %v2518_v56  ;;  %v8733_v63 = vld [vmem:[%s9446_s16] ss:$0 sm:$0xff] }
 0x742   : > { %v2680_v54 = vsel %vm652_vm0, %v2679_v12, 0.0 }
 0x743   : > { %2681 = vadd.xlane.f32.xlu0 %v2680_v54 }
 0x7cc   : > { %v2682_v14 = vpop.xlane.xlu0 %2681 }
 0x7cd   : > { %v2683_v60 = vmul.f32 0.03125, %v2682_v14 }
 0x7cf   : > { %v2684_v59 = vsub.f32 %v2679_v12, %v2683_v60 }
 0x7d1   : > { %v2685_v62 = vmul.f32 %v2684_v59, %v2684_v59 }
 0x7d3   : > { %v2686_v16 = vsel %vm652_vm0, %v2685_v62, 0.0 }
 0x7d4   : > { %2687 = vadd.xlane.f32.xlu1 %v2686_v16 }
 0x85d   : > { %v2688_v7 = vpop.xlane.xlu1 %2687 }
 0x85e   : > { %v2689_v61 = vmul.f32 0.03125, %v2688_v7 }
 0x860   : > { %v2690_v57 = vadd.f32 1e-05, %v2689_v61 }
 0x862   : > { %7789 = vrsqrt.f32 %v2690_v57 }
 0x86f   : > { %v7790_v5 = vpop.eup %7789 }
 0x870   : > { %v2692_v56 = vmul.f32 %v7790_v5, %v2684_v59  ;;  %v9519_v5 = vld [vmem:[#allocation17_spill] sm:$0xff]  ;;  %v9520_v59 = vld [vmem:[#allocation14_spill] sm:$0xff] }
 0x872   : > { %v2699_v55 = vmul.f32 %v8728_v51, %v2692_v56  ;;  %v9521_v56 = vld [vmem:[#allocation16_spill] sm:$0xff] }
 0x874   : > { %v8737_v12 = vadd.f32 %v8733_v63, %v2699_v55 }
 0x876   : > { %7326 = vmatmul.mubr.msk.f32.vlgmr.msra.gmra.mxu0 %vm652_vm0, %v8737_v12  ;;  %7348 = vmatmul.mubr.msk.f32.vlgmr.msra.gmra.mxu1 %vm652_vm0, %v8737_v12 }
 0x877   : > { %7329 = vmatpush3.msra.mxu0 %v8030_v1  ;;  %7362 = vmatpush3.msra.mxu1 %v8159_v18  ;;  %v9506_v1 = vld [vmem:[#allocation2_spill] sm:$0xff] }
 0x878   : > { %7330 = vmatprep.subr.mxu0 %v9491_v49  ;;  %7363 = vmatprep.subr.mxu1 %v9491_v49 }
 0x879   : > { %7331 = vmatpush3.msra.mxu0 %v8042_v4  ;;  %7364 = vmatpush3.msra.mxu1 %v8175_v20  ;;  %v9507_v4 = vld [vmem:[#allocation3_spill] sm:$0xff] }
 0x87a   : > { %7332 = vmatprep.subr.mxu0 %v9491_v49  ;;  %7365 = vmatprep.subr.mxu1 %v9491_v49 }
 0x87b   : > { %7333 = vmatpush3.msra.mxu0 %v8058_v6  ;;  %7366 = vmatpush3.msra.mxu1 %v8189_v22  ;;  %v9508_v6 = vld [vmem:[#allocation4_spill] sm:$0xff]  ;;  %v9513_v22 = vld [vmem:[#allocation9_spill] sm:$0xff] }
 0x87c   : > { %7334 = vmatprep.subr.mxu0 %v9491_v49  ;;  %7367 = vmatprep.subr.mxu1 %v9491_v49 }
 0x87d   : > { %7335 = vmatpush3.msra.mxu0 %v8080_v8  ;;  %7336 = vmatprep.mubr.msk.f32.mxu0 %vm7923_vm1, %v9491_v49  ;;  %v9509_v8 = vld [vmem:[#allocation5_spill] sm:$0xff] }
 0x87e   : > { %7368 = vmatpush3.msra.mxu1 %v8203_v24  ;;  %7369 = vmatprep.mubr.msk.f32.mxu1 %vm7923_vm1, %v9491_v49 }
 0x87f   : > { %7337 = vmatmul.mubr.msk.f32.vlgmr.msra.gmra.mxu0 %vm652_vm0, %v8737_v12  ;;  %7350 = vmatprep.subr.mxu0 %v9491_v49 }
 0x880   : > { %7370 = vmatmul.mubr.msk.f32.vlgmr.msra.gmra.mxu1 %vm652_vm0, %v8737_v12  ;;  %7383 = vmatprep.subr.mxu1 %v9491_v49 }
 0x881   : > { %7351 = vmatpush3.msra.mxu0 %v8100_v11  ;;  %7384 = vmatpush3.msra.mxu1 %v8223_v26  ;;  %v9510_v11 = vld [vmem:[#allocation6_spill] sm:$0xff] }
 0x882   : > { %7352 = vmatprep.subr.mxu0 %v9491_v49  ;;  %7385 = vmatprep.subr.mxu1 %v9491_v49 }
 0x883   : > { %7353 = vmatpush3.msra.mxu0 %v8116_v13  ;;  %7386 = vmatpush3.msra.mxu1 %v8239_v28  ;;  %v9511_v13 = vld [vmem:[#allocation7_spill] sm:$0xff] }
 0x884   : > { %7354 = vmatprep.subr.mxu0 %v9491_v49  ;;  %7387 = vmatprep.subr.mxu1 %v9491_v49 }
 0x885   : > { %7355 = vmatpush3.msra.mxu0 %v8130_v15  ;;  %7388 = vmatpush3.msra.mxu1 %v8253_v30  ;;  %v9512_v15 = vld [vmem:[#allocation8_spill] sm:$0xff] }
 0x886   : > { %7356 = vmatprep.subr.mxu0 %v9491_v49  ;;  %7389 = vmatprep.subr.mxu1 %v9491_v49 }
 0x887   : > { %7357 = vmatpush3.msra.mxu0 %v8146_v17  ;;  %7358 = vmatprep.mubr.msk.f32.mxu0 %vm7923_vm1, %v9491_v49 }
 0x888   : > { %7390 = vmatpush3.msra.mxu1 %v8267_v32  ;;  %7391 = vmatprep.mubr.msk.f32.mxu1 %vm7923_vm1, %v9491_v49 }
 0x889   : > { %7359 = vmatmul.mubr.msk.f32.vlgmr.msra.gmra.mxu0 %vm652_vm0, %v8737_v12  ;;  %7372 = vmatprep.subr.mxu0 %v9491_v49 }
 0x88a   : > { %7392 = vmatmul.mubr.msk.f32.vlgmr.msra.gmra.mxu1 %vm652_vm0, %v8737_v12  ;;  %7405 = vmatprep.subr.mxu1 %v9491_v49 }
 0x88b   : > { %7373 = vmatpush3.msra.mxu0 %v8164_v19  ;;  %7406 = vmatpush3.msra.mxu1 %v8297_v34  ;;  %v9516_v34 = vld [vmem:[#allocation15_spill] sm:$0xff] }
 0x88c   : > { %7374 = vmatprep.subr.mxu0 %v9491_v49  ;;  %7407 = vmatprep.subr.mxu1 %v9491_v49 }
 0x88d   : > { %7375 = vmatpush3.msra.mxu0 %v8180_v21  ;;  %7408 = vmatpush3.msra.mxu1 %v8304_v35 }
 0x88e   : > { %7376 = vmatprep.subr.mxu0 %v9491_v49  ;;  %7409 = vmatprep.subr.mxu1 %v9491_v49 }
 0x88f   : > { %7377 = vmatpush3.msra.mxu0 %v8194_v23  ;;  %7410 = vmatpush3.msra.mxu1 %v8309_v36 }
 0x890   : > { %7378 = vmatprep.subr.mxu0 %v9491_v49  ;;  %7411 = vmatprep.subr.mxu1 %v9491_v49 }
 0x891   : > { %7379 = vmatpush3.msra.mxu0 %v8210_v25  ;;  %7380 = vmatprep.mubr.msk.f32.mxu0 %vm7923_vm1, %v9491_v49  ;;  %v9514_v25 = vld [vmem:[#allocation10_spill] sm:$0xff] }
 0x892   : > { %7412 = vmatpush3.msra.mxu1 %v8316_v37  ;;  %7413 = vmatprep.mubr.msk.f32.mxu1 %vm7923_vm1, %v9491_v49 }
 0x893   : > { %7381 = vmatmul.mubr.msk.f32.vlgmr.msra.gmra.mxu0 %vm652_vm0, %v8737_v12  ;;  %7394 = vmatprep.subr.mxu0 %v9491_v49 }
 0x894   : > { %7414 = vmatmul.mubr.msk.f32.vlgmr.msra.gmra.mxu1 %vm652_vm0, %v8737_v12  ;;  %7427 = vmatprep.subr.mxu1 %v9491_v49 }
 0x895   : > { %7395 = vmatpush3.msra.mxu0 %v8228_v27  ;;  %7428 = vmatpush3.msra.mxu1 %v8329_v38 }
 0x896   : > { %7396 = vmatprep.subr.mxu0 %v9491_v49  ;;  %7429 = vmatprep.subr.mxu1 %v9491_v49 }
 0x897   : > { %7397 = vmatpush3.msra.mxu0 %v8244_v29  ;;  %7430 = vmatpush3.msra.mxu1 %v8341_v40 }
 0x898   : > { %7398 = vmatprep.subr.mxu0 %v9491_v49  ;;  %7431 = vmatprep.subr.mxu1 %v9491_v49 }
 0x899   : > { %7399 = vmatpush3.msra.mxu0 %v8258_v31  ;;  %7432 = vmatpush3.msra.mxu1 %v8353_v42  ;;  %v9515_v31 = vld [vmem:[#allocation13_spill] sm:$0xff] }
 0x89a   : > { %7400 = vmatprep.subr.mxu0 %v9491_v49  ;;  %7433 = vmatprep.subr.mxu1 %v9491_v49 }
 0x89b   : > { %7401 = vmatpush3.msra.mxu0 %v8274_v33  ;;  %7402 = vmatprep.mubr.msk.f32.mxu0 %vm7923_vm1, %v9491_v49 }
 0x89c   : > { %7434 = vmatpush3.msra.mxu1 %v8365_v44  ;;  %7435 = vmatprep.mubr.msk.f32.mxu1 %vm7923_vm1, %v9491_v49  ;;  %v9518_v44 = vld [vmem:[#allocation11_spill] sm:$0xff] }
 0x89d   : > { %7403 = vmatmul.mubr.msk.f32.vlgmr.msra.gmra.mxu0 %vm652_vm0, %v8737_v12  ;;  %7416 = vmatprep.subr.mxu0 %v9491_v49 }
 0x89e   : > { %7436 = vmatmul.mubr.msk.f32.vlgmr.msra.gmra.mxu1 %vm652_vm0, %v8737_v12  ;;  %7417 = vmatpush3.msra.mxu0 %v8336_v39  ;;  %v9517_v39 = vld [vmem:[#allocation12_spill] sm:$0xff] }
 0x89f   : > { %7418 = vmatprep.subr.mxu0 %v9491_v49  ;;  %7424 = vmatprep.mubr.msk.f32.mxu0 %vm7923_vm1, %v9491_v49 }
 0x8a0   : > { %7419 = vmatpush3.msra.mxu0 %v9506_v1  ;;  %7449 = vmatprep.subr.mxu1 %v9491_v49 }
 0x8a1   : > { %7420 = vmatprep.subr.mxu0 %v9491_v49  ;;  %7451 = vmatprep.mubr.msk.f32.mxu1 %vm7923_vm1, %v9491_v49 }
 0x8a2   : > { %7421 = vmatpush3.msra.mxu0 %v9507_v4 }
 0x8a3   : > { %7422 = vmatprep.subr.mxu0 %v9491_v49 }
 0x8a4   : > { %7423 = vmatpush3.msra.mxu0 %v9508_v6 }
 0x8a5   : > { %7425 = vmatmul.mubr.msk.f32.vlgmr.msra.gmra.mxu0 %vm652_vm0, %v8737_v12  ;;  %7438 = vmatprep.subr.mxu0 %v9491_v49 }
 0x8a6   : > { %7439 = vmatpush3.msra.mxu0 %v9509_v8  ;;  %7446 = vmatprep.mubr.msk.f32.mxu0 %vm7923_vm1, %v9491_v49 }
 0x8a7   : > { %7440 = vmatprep.subr.mxu0 %v9491_v49 }
 0x8a8   : > { %7441 = vmatpush3.msra.mxu0 %v9510_v11 }
 0x8a9   : > { %7442 = vmatprep.subr.mxu0 %v9491_v49 }
 0x8aa   : > { %7443 = vmatpush3.msra.mxu0 %v9511_v13  ;;  %v9522_v13 = vld [vmem:[#allocation18_spill] sm:$0xff] }
 0x8ab   : > { %7444 = vmatprep.subr.mxu0 %v9491_v49 }
 0x8ac   : > { %7445 = vmatpush3.msra.mxu0 %v9512_v15 }
 0x8ad   : > { %7447 = vmatmul.mubr.msk.f32.vlgmr.msra.gmra.mxu0 %vm652_vm0, %v8737_v12  ;;  %7459 = vmatprep.subr.mxu0 %v9491_v49 }
 0x8ae   : > { %7461 = vmatprep.mubr.msk.f32.mxu0 %vm7923_vm1, %v9491_v49 }
 0x936   : > { %v2776_v17 = vpop.f32.mrf.mxu0  ;;  %v2916_v18 = vpop.f32.mrf.mxu1 }
 0x937   : > { %v2777_v23 = vadd.f32 %v9513_v22, %v2776_v17  ;;  %v2917_v32 = vadd.f32 %v9515_v31, %v2916_v18 }
 0x938   : > { %v7327_v19 = vpop.f32.mrf.mxu0  ;;  %v7349_v20 = vpop.f32.mrf.mxu1 }
 0x939   : > { %v2990_v29 = vmul.f32 0.35355338, %v2777_v23  ;;  %v2992_v38 = vmul.f32 0.35355338, %v2917_v32 }
 0x93f   : > { %v2846_v21 = vpop.f32.mrf.mxu0 }
 0x940   : > { %v3060_v24 = vpop.f32.mrf.mxu1  ;;  %v2847_v40 = vadd.f32 %v9517_v39, %v2846_v21 }
 0x941   : > { %v3061_v26 = vadd.f32 %v9514_v25, %v3060_v24  ;;  %v7338_v27 = vpop.f32.mrf.mxu0 }
 0x942   : > { %v7371_v28 = vpop.f32.mrf.mxu1  ;;  %v2991_v60 = vmul.f32 0.35355338, %v2847_v40 }
 0x943   : > { %7450 = vmatpush3.xpose.msk.msra.mxu1 %vm1548_vm2, %v3061_v26 }
 0x944   : > { %7454 = vmatprep.subr.mxu1 %v9491_v49 }
 0x946   : > { %7452 = vmatmul.mubr.msk.f32.vlgmr.msra.gmra.mxu1 %vm1548_vm2, %v2990_v29 }
 0x947   : > { %7456 = vmatprep.mubr.msk.f32.mxu1 %vm7923_vm1, %v9491_v49 }
 0x949   : > { %v2986_v30 = vpop.f32.mrf.mxu0 }
 0x94a   : > { %v3200_v33 = vpop.f32.mrf.mxu1  ;;  %v2987_v62 = vadd.f32 %v9520_v59, %v2986_v30 }
 0x94b   : > { %v3201_v35 = vadd.f32 %v9516_v34, %v3200_v33  ;;  %v7360_v36 = vpop.f32.mrf.mxu0 }
 0x94c   : > { %v7393_v37 = vpop.f32.mrf.mxu1  ;;  %v2993_v8 = vmul.f32 0.35355338, %v2987_v62 }
 0x94d   : > { %7460 = vmatpush3.xpose.msk.msra.mxu0 %vm1548_vm2, %v3201_v35 }
 0x94e   : > { %7469 = vmatprep.subr.mxu0 %v9491_v49 }
 0x950   : > { %7462 = vmatmul.mubr.msk.f32.vlgmr.msra.gmra.mxu0 %vm1548_vm2, %v2992_v38 }
 0x951   : > { %7471 = vmatprep.mubr.msk.f32.mxu0 %vm7923_vm1, %v9491_v49 }
 0x953   : > { %v3130_v42 = vpop.f32.mrf.mxu0 }
 0x954   : > { %v3131_v61 = vadd.f32 %v9518_v44, %v3130_v42  ;;  %v3340_v57 = vpop.f32.mrf.mxu1 }
 0x955   : > { %v3341_v7 = vadd.f32 %v9519_v5, %v3340_v57  ;;  %v7382_v54 = vpop.f32.mrf.mxu0 }
 0x956   : > { %v7415_v14 = vpop.f32.mrf.mxu1  ;;  %7455 = vmatpush3.xpose.msk.msra.mxu1 %vm1548_vm2, %v3131_v61 }
 0x957   : > { %7470 = vmatpush3.msra.mxu0 %v3341_v7  ;;  %7464 = vmatprep.subr.mxu1 %v9491_v49 }
 0x958   : > { %7479 = vmatprep.subr.mxu0 %v9491_v49 }
 0x959   : > { %7457 = vmatmul.mubr.msk.f32.vlgmr.msra.gmra.mxu1 %vm1548_vm2, %v2991_v60 }
 0x95a   : > { %7466 = vmatprep.mubr.msk.f32.mxu1 %vm7923_vm1, %v9491_v49 }
 0x95d   : > { %v3270_v16 = vpop.f32.mrf.mxu0 }
 0x95e   : > { %v3271_v55 = vadd.f32 %v9521_v56, %v3270_v16  ;;  %v8892_v1 = vpop.f32.mrf.mxu1 }
 0x95f   : > { %v7404_v4 = vpop.f32.mrf.mxu0 }
 0x960   : > { %v7437_v6 = vpop.f32.mrf.mxu1  ;;  %7465 = vmatpush3.xpose.msk.msra.mxu1 %vm1548_vm2, %v3271_v55 }
 0x961   : > { %7474 = vmatprep.subr.mxu1 %v9491_v49  ;;  %v3481_v6 = vadd.f32 %v8519_v58, %v8892_v1 }
 0x963   : > { %7467 = vmatmul.mubr.msk.f32.vlgmr.msra.gmra.mxu1 %vm1548_vm2, %v2993_v8 }
 0x964   : > { %7476 = vmatprep.mubr.msk.f32.mxu1 %vm7923_vm1, %v9491_v49 }
 0x965   : > { %v3410_v11 = vpop.f32.mrf.mxu0 }
 0x966   : > { %v3411_v15 = vadd.f32 %v9522_v13, %v3410_v11 }
 0x967   : > { %v7426_v17 = vpop.f32.mrf.mxu0 }
 0x968   : > { %7475 = vmatpush3.msra.mxu1 %v3411_v15 }
 0x969   : > { %7484 = vmatprep.subr.mxu1 %v9491_v49 }
 0x96d   : > { %v8901_v18 = vpop.f32.mrf.mxu0 }
 0x96e   : > { %v3551_v17 = vadd.f32 %v8526_v52, %v8901_v18 }
 0x96f   : > { %v7448_v19 = vpop.f32.mrf.mxu0 }
 0xa06   : > { %v3626_v20 = vpop.f32.mrf.mxu1 }
 0xa07   : > { %v3858_v21 = vsel %vm1548_vm2, %v3626_v20, -inf }
 0xa08   : > { %3859 = vmax.xlane.f32.xlu0 %v3858_v21  ;;  %v7453_v22 = vpop.f32.mrf.mxu1 }
 0xa10   : > { %v3778_v23 = vpop.f32.mrf.mxu0 }
 0xa11   : > { %v3864_v24 = vsel %vm1548_vm2, %v3778_v23, -inf }
 0xa12   : > { %3865 = vmax.xlane.f32.xlu0 %v3864_v24  ;;  %v7463_v25 = vpop.f32.mrf.mxu0 }
 0xa19   : > { %v3702_v26 = vpop.f32.mrf.mxu1 }
 0xa1a   : > { %v3861_v27 = vsel %vm1548_vm2, %v3702_v26, -inf }
 0xa1b   : > { %3862 = vmax.xlane.f32.xlu1 %v3861_v27  ;;  %v7458_v28 = vpop.f32.mrf.mxu1 }
 0xa23   : > { %v3854_v29 = vpop.f32.mrf.mxu1 }
 0xa24   : > { %v3867_v30 = vsel %vm1548_vm2, %v3854_v29, -inf }
 0xa25   : > { %3868 = vmax.xlane.f32.xlu1 %v3867_v30  ;;  %v7468_v31 = vpop.f32.mrf.mxu1 }
 0xa26   : > { %v9527_v31 = vld [vmem:[#allocation19_spill] sm:$0xff] }
 0xa91   : > { %v3860_v32 = vpop.xlane.xlu0 %3859 }
 0xa92   : > { %v3870_v33 = vsub.f32 %v3626_v20, %v3860_v32 }
 0xa94   : > { %v3874_v34 = vmul.f32 1.442695, %v3870_v33 }
 0xa96   : > { %7791 = vpow2.f32 %v3874_v34 }
 0xa9b   : > { %v3866_v35 = vpop.xlane.xlu0 %3865 }
 0xa9c   : > { %v3872_v36 = vsub.f32 %v3778_v23, %v3866_v35 }
 0xa9e   : > { %v3878_v37 = vmul.f32 1.442695, %v3872_v36 }
 0xaa0   : > { %7793 = vpow2.f32 %v3878_v37 }
 0xaa3   : > { %v7792_v38 = vpop.eup %7791 }
 0xaa4   : > { %v3863_v39 = vpop.xlane.xlu1 %3862  ;;  %v3882_v40 = vsel %vm1548_vm2, %v7792_v38, 0.0 }
 0xaa5   : > { %v3871_v42 = vsub.f32 %v3702_v26, %v3863_v39  ;;  %3883 = vadd.xlane.f32.xlu0 %v3882_v40 }
 0xaa7   : > { %v3876_v44 = vmul.f32 1.442695, %v3871_v42 }
 0xaa9   : > { %7795 = vpow2.f32 %v3876_v44 }
 0xaad   : > { %v7794_v61 = vpop.eup %7793 }
 0xaae   : > { %v3869_v57 = vpop.xlane.xlu1 %3868  ;;  %v3888_v5 = vsel %vm1548_vm2, %v7794_v61, 0.0 }
 0xaaf   : > { %v3873_v7 = vsub.f32 %v3854_v29, %v3869_v57  ;;  %3889 = vadd.xlane.f32.xlu0 %v3888_v5  ;;  %v9528_v57 = vld [vmem:[#allocation23_spill] sm:$0xff] }
 0xab1   : > { %v3880_v54 = vmul.f32 1.442695, %v3873_v7  ;;  %v9529_v7 = vld [vmem:[#allocation24_spill] sm:$0xff] }
 0xab3   : > { %7797 = vpow2.f32 %v3880_v54  ;;  %v7831_v54 = vld [vmem:[%s9478_s28 + $0x18] sm:$0xff] }
 0xab6   : > { %v7796_v14 = vpop.eup %7795 }
 0xab7   : > { %v3885_v60 = vsel %vm1548_vm2, %v7796_v14, 0.0 }
 0xab8   : > { %3886 = vadd.xlane.f32.xlu1 %v3885_v60  ;;  %v7833_v60 = vld [vmem:[%s9478_s28 + $0x8] sm:$0xff] }
 0xac0   : > { %v7798_v59 = vpop.eup %7797 }
 0xac1   : > { %v3891_v62 = vsel %vm1548_vm2, %v7798_v59, 0.0 }
 0xac2   : > { %3892 = vadd.xlane.f32.xlu1 %v3891_v62 }
 0xb2e   : > { %v3884_v16 = vpop.xlane.xlu0 %3883 }
 0xb2f   : > { %7799 = vrcp.f32 %v3884_v16  ;;  %v9530_v16 = vld [vmem:[#allocation26_spill] sm:$0xff] }
 0xb38   : > { %v3890_v56 = vpop.xlane.xlu0 %3889 }
 0xb39   : > { %7801 = vrcp.f32 %v3890_v56 }
 0xb3c   : > { %v7800_v55 = vpop.eup %7799 }
 0xb3d   : > { %v3898_v4 = vmul.f32 %v7800_v55, %v7792_v38 }
 0xb3f   : > { %7472 = vmatmul.mubr.msk.f32.vlgmr.msra.gmra.mxu0 %vm1548_vm2, %v3898_v4 }
 0xb40   : > { %7480 = vmatpush3.msra.mxu0 %v3481_v6  ;;  %7481 = vmatprep.mubr.msk.f32.mxu0 %vm7923_vm1, %v9491_v49  ;;  %v7835_v6 = vld [vmem:[%s9478_s28 + $0x58] sm:$0xff] }
 0xb41   : > { %v3887_v8 = vpop.xlane.xlu1 %3886  ;;  %7489 = vmatprep.subr.mxu0 %v9491_v49 }
 0xb42   : > { %7803 = vrcp.f32 %v3887_v8  ;;  %v7836_v8 = vld [vmem:[%s9478_s28 + $0x50] sm:$0xff] }
 0xb46   : > { %v7802_v11 = vpop.eup %7801 }
 0xb47   : > { %v3900_v13 = vmul.f32 %v7802_v11, %v7794_v61  ;;  %v7837_v11 = vld [vmem:[%s9478_s28 + $0x48] sm:$0xff] }
 0xb49   : > { %7482 = vmatmul.mubr.msk.f32.vlgmr.msra.gmra.mxu0 %vm1548_vm2, %v3900_v13  ;;  %v7838_v13 = vld [vmem:[%s9478_s28 + $0x40] sm:$0xff] }
 0xb4a   : > { %7490 = vmatpush3.msra.mxu0 %v8554_v47  ;;  %7491 = vmatprep.mubr.msk.f32.mxu0 %vm7923_vm1, %v9491_v49 }
 0xb4b   : > { %v3893_v58 = vpop.xlane.xlu1 %3892  ;;  %7499 = vmatprep.subr.mxu0 %v9491_v49 }
 0xb4c   : > { %7805 = vrcp.f32 %v3893_v58 }
 0xb4f   : > { %v7804_v1 = vpop.eup %7803 }
 0xb50   : > { %v3899_v15 = vmul.f32 %v7804_v1, %v7796_v14  ;;  %v7832_v14 = vld [vmem:[%s9478_s28 + $0x10] sm:$0xff] }
 0xb52   : > { %7477 = vmatmul.mubr.msk.f32.vlgmr.msra.gmra.mxu1 %vm1548_vm2, %v3899_v15 }
 0xb53   : > { %7485 = vmatpush3.msra.mxu1 %v3551_v17  ;;  %7486 = vmatprep.mubr.msk.f32.mxu1 %vm7923_vm1, %v9491_v49 }
 0xb54   : > { %7494 = vmatprep.subr.mxu1 %v9491_v49 }
 0xb59   : > { %v7806_v47 = vpop.eup %7805 }
 0xb5a   : > { %v3901_v19 = vmul.f32 %v7806_v47, %v7798_v59  ;;  %v7834_v59 = vld [vmem:[%s9478_s28] sm:$0xff] }
 0xb5c   : > { %7487 = vmatmul.mubr.msk.f32.vlgmr.msra.gmra.mxu1 %vm1548_vm2, %v3901_v19 }
 0xb5d   : > { %7495 = vmatpush3.msra.mxu1 %v8547_v50  ;;  %7496 = vmatprep.mubr.msk.f32.mxu1 %vm7923_vm1, %v9491_v49 }
 0xb5e   : > { %7504 = vmatprep.subr.mxu1 %v9491_v49 }
 0xbff   : > { %v3971_v52 = vpop.f32.mrf.mxu0 }
 0xc00   : > { %7497 = vmatmul.mubr.msk.f32.vlgmr.msra.gmra.mxu1 %vm1548_vm2, %v3971_v52 }
 0xc01   : > { %v7473_v18 = vpop.f32.mrf.mxu0  ;;  %7505 = vmatpush3.msra.mxu1 %v8561_v2  ;;  %7506 = vmatprep.mubr.msk.f32.mxu1 %vm7923_vm1, %v9491_v49 }
 0xc02   : > { %7520 = vmatprep.subr.mxu1 %v9491_v49 }
 0xc09   : > { %v4117_v20 = vpop.f32.mrf.mxu0 }
 0xc0b   : > { %v7483_v21 = vpop.f32.mrf.mxu0 }
 0xc12   : > { %v4044_v22 = vpop.f32.mrf.mxu1 }
 0xc13   : > { %7492 = vmatmul.mubr.msk.f32.vlgmr.msra.gmra.mxu0 %vm1548_vm2, %v4044_v22 }
 0xc14   : > { %v7478_v50 = vpop.f32.mrf.mxu1  ;;  %7500 = vmatpush3.msra.mxu0 %v8570_v45  ;;  %7501 = vmatprep.mubr.msk.f32.mxu0 %vm7923_vm1, %v9491_v49 }
 0xc15   : > { %7509 = vmatprep.subr.mxu0 %v9491_v49 }
 0xc17   : > { %7502 = vmatmul.mubr.msk.f32.vlgmr.msra.gmra.mxu0 %vm1548_vm2, %v4117_v20 }
 0xc18   : > { %7510 = vmatpush3.msra.mxu0 %v8596_v53  ;;  %7517 = vmatprep.mubr.msk.f32.mxu0 %vm7923_vm1, %v9491_v49  ;;  %v9523_v53 = vld [vmem:[#allocation20_spill] sm:$0xff] }
 0xc19   : > { %7511 = vmatprep.subr.mxu0 %v9491_v49 }
 0xc1a   : > { %7512 = vmatpush3.msra.mxu0 %v8603_v9  ;;  %v9524_v9 = vld [vmem:[#allocation21_spill] sm:$0xff] }
 0xc1b   : > { %7513 = vmatprep.subr.mxu0 %v9491_v49 }
 0xc1c   : > { %v4190_v2 = vpop.f32.mrf.mxu1  ;;  %7514 = vmatpush3.msra.mxu0 %v8608_v48  ;;  %v9525_v48 = vld [vmem:[#allocation22_spill] sm:$0xff] }
 0xc1d   : > { %7507 = vmatmul.mubr.msk.f32.vlgmr.msra.gmra.mxu1 %vm1548_vm2, %v4190_v2  ;;  %7515 = vmatprep.subr.mxu0 %v9491_v49 }
 0xc1e   : > { %v7488_v45 = vpop.f32.mrf.mxu1  ;;  %7516 = vmatpush3.msra.mxu0 %v8615_v46  ;;  %7521 = vmatpush3.msra.mxu1 %v8623_v43  ;;  %v9526_v46 = vld [vmem:[#allocation25_spill] sm:$0xff] }
 0xc1f   : > { %7522 = vmatprep.subr.mxu1 %v9491_v49  ;;  %7536 = vmatprep.mubr.msk.f32.mxu1 %vm7923_vm1, %v9491_v49 }
 0xc20   : > { %7523 = vmatpush3.msra.mxu1 %v8628_v41  ;;  %7539 = vmatprep.subr.mxu0 %v9491_v49 }
 0xc21   : > { %7524 = vmatprep.subr.mxu1 %v9491_v49 }
 0xc22   : > { %7525 = vmatpush3.msra.mxu1 %v9523_v53 }
 0xc23   : > { %7526 = vmatprep.subr.mxu1 %v9491_v49 }
 0xc24   : > { %7527 = vmatpush3.msra.mxu1 %v9524_v9 }
 0xc25   : > { %7528 = vmatprep.subr.mxu1 %v9491_v49 }
 0xc26   : > { %7529 = vmatpush3.msra.mxu1 %v9525_v48  ;;  %v7839_v48 = vld [vmem:[%s9478_s28 + $0x38] sm:$0xff] }
 0xc27   : > { %7530 = vmatprep.subr.mxu1 %v9491_v49 }
 0xc28   : > { %7531 = vmatpush3.msra.mxu1 %v8682_v0 }
 0xc29   : > { %7532 = vmatprep.subr.mxu1 %v9491_v49 }
 0xc2a   : > { %7533 = vmatpush3.msra.mxu1 %v8689_v3 }
 0xc2b   : > { %7534 = vmatprep.subr.mxu1 %v9491_v49 }
 0xc2c   : > { %7535 = vmatpush3.msra.mxu1 %v9526_v46  ;;  %v7840_v46 = vld [vmem:[%s9432_s2 + $0x18] sm:$0xff] }
 0xc2d   : > { %7561 = vmatprep.subr.mxu1 %v9491_v49 }
 0xcc0   : > { %v4336_v43 = vpop.f32.mrf.mxu1 }
 0xcc2   : > { %v7498_v41 = vpop.f32.mrf.mxu1 }
 0xcc3   : > { %v7844_v41 = vld [vmem:[%s9432_s2 + $0x8] sm:$0xff] }
 0xcd3   : > { %v4263_v23 = vpop.f32.mrf.mxu0 }
 0xcd4   : > { %v4337_v27 = vadd.f32 %v4336_v43, %v4263_v23  ;;  %v7843_v43 = vld [vmem:[%s9478_s28 + $0x28] sm:$0xff]  ;;  %v7845_v23 = vld [vmem:[%s9478_s28 + $0x20] sm:$0xff] }
 0xcd5   : > { %v7493_v24 = vpop.f32.mrf.mxu0 }
 0xcd6   : > { %v7846_v24 = vld [vmem:[%s9432_s2] sm:$0xff] }
 0xcd7   : > { %v4409_v25 = vpop.f32.mrf.mxu0 }
 0xcd8   : > { %v4413_v28 = vadd.f32 %v4409_v25, %v4337_v27  ;;  %v7847_v25 = vld [vmem:[%s9478_s28 + $0x78] sm:$0xff]  ;;  %v7849_v27 = vld [vmem:[%s9478_s28 + $0x70] sm:$0xff] }
 0xcd9   : > { %v7503_v26 = vpop.f32.mrf.mxu0 }
 0xcda   : > { %v7848_v26 = vld [vmem:[%s9432_s2 + $0x58] sm:$0xff] }
 0xcdd   : > { %v4483_v29 = vpop.f32.mrf.mxu1 }
 0xcde   : > { %v4487_v0 = vadd.f32 %v4483_v29, %v4413_v28  ;;  %v7850_v28 = vld [vmem:[%s9432_s2 + $0x50] sm:$0xff]  ;;  %v7851_v29 = vld [vmem:[%s9478_s28 + $0x68] sm:$0xff] }
 0xcdf   : > { %v7508_v30 = vpop.f32.mrf.mxu1 }
 0xce0   : > { %v4488_v32 = vadd.f32 %v9527_v31, %v4487_v0  ;;  %v7852_v0 = vld [vmem:[%s9432_s2 + $0x48] sm:$0xff]  ;;  %v7853_v30 = vld [vmem:[%s9478_s28 + $0x60] sm:$0xff] }
 0xce1   : > { %v7854_v31 = vld [vmem:[%s9432_s2 + $0x40] sm:$0xff] }
 0xce2   : > { %v4489_v3 = vadd.f32 %v4488_v32, %v8737_v12  ;;  %v7855_v32 = vld [vmem:[%s9432_s2 + $0x38] sm:$0xff] }
 0xce4   : > { %v4490_v33 = vsel %vm652_vm0, %v4489_v3, 0.0 }
 0xce5   : > { %4491 = vadd.xlane.f32.xlu0 %v4490_v33  ;;  %v7857_v33 = vld [vmem:[%s9432_s2 + $0x30] sm:$0xff] }
 0xd6e   : > { %v4492_v34 = vpop.xlane.xlu0 %4491 }
 0xd6f   : > { %v4493_v35 = vmul.f32 0.03125, %v4492_v34  ;;  %v7858_v34 = vld [vmem:[%s9433_s3 + $0x10] sm:$0xff] }
 0xd71   : > { %v4494_v36 = vsub.f32 %v4489_v3, %v4493_v35  ;;  %v7856_v3 = vld [vmem:[%s9433_s3 + $0x18] sm:$0xff]  ;;  %v7859_v35 = vld [vmem:[%s9432_s2 + $0x28] sm:$0xff] }
 0xd73   : > { %v4495_v37 = vmul.f32 %v4494_v36, %v4494_v36 }
 0xd75   : > { %v4496_v38 = vsel %vm652_vm0, %v4495_v37, 0.0  ;;  %v7861_v37 = vld [vmem:[%s9432_s2 + $0x20] sm:$0xff] }
 0xd76   : > { %4497 = vadd.xlane.f32.xlu1 %v4496_v38  ;;  %v7862_v38 = vld [vmem:[%s9433_s3] sm:$0xff] }
 0xdff   : > { %v4498_v39 = vpop.xlane.xlu1 %4497 }
 0xe00   : > { %v4499_v40 = vmul.f32 0.03125, %v4498_v39  ;;  %v7863_v39 = vld [vmem:[%s9432_s2 + $0x78] sm:$0xff] }
 0xe02   : > { %v4500_v42 = vadd.f32 1e-05, %v4499_v40  ;;  %v7864_v40 = vld [vmem:[%s9433_s3 + $0x58] sm:$0xff] }
 0xe04   : > { %7807 = vrsqrt.f32 %v4500_v42  ;;  %v7865_v42 = vld [vmem:[%s9432_s2 + $0x70] sm:$0xff] }
 0xe11   : > { %v7808_v44 = vpop.eup %7807 }
 0xe12   : > { %v4502_v61 = vmul.f32 %v7808_v44, %v4494_v36  ;;  %v7860_v36 = vld [vmem:[%s9433_s3 + $0x8] sm:$0xff]  ;;  %v7866_v44 = vld [vmem:[%s9433_s3 + $0x50] sm:$0xff] }
 0xe14   : > { %v4503_v5 = vmul.f32 %v9528_v57, %v4502_v61  ;;  %v7867_v61 = vld [vmem:[%s9432_s2 + $0x68] sm:$0xff] }
 0xe15   : > { %v7868_v57 = vld [vmem:[%s9433_s3 + $0x48] sm:$0xff] }
 0xe16   : > { %v4504_v12 = vadd.f32 %v9529_v7, %v4503_v5  ;;  %v7869_v5 = vld [vmem:[%s9432_s2 + $0x60] sm:$0xff] }
 0xe17   : > { %v7870_v7 = vld [vmem:[%s9433_s3 + $0x40] sm:$0xff] }
 0xe18   : > { %7518 = vmatmul.mubr.msk.f32.vlgmr.msra.gmra.mxu0 %vm652_vm0, %v4504_v12 }
 0xe19   : > { %7540 = vmatpush3.msra.mxu0 %v7831_v54  ;;  %7547 = vmatprep.mubr.msk.f32.mxu0 %vm7923_vm1, %v9491_v49  ;;  %v7872_v54 = vld [vmem:[%s9433_s3 + $0x30] sm:$0xff] }
 0xe1a   : > { %7541 = vmatprep.subr.mxu0 %v9491_v49 }
 0xe1b   : > { %7542 = vmatpush3.msra.mxu0 %v7832_v14  ;;  %v7873_v14 = vld [vmem:[%s9433_s3 + $0x28] sm:$0xff] }
 0xe1c   : > { %7543 = vmatprep.subr.mxu0 %v9491_v49 }
 0xe1d   : > { %7544 = vmatpush3.msra.mxu0 %v7833_v60  ;;  %v7874_v60 = vld [vmem:[%s9433_s3 + $0x20] sm:$0xff] }
 0xe1e   : > { %7545 = vmatprep.subr.mxu0 %v9491_v49 }
 0xe1f   : > { %7546 = vmatpush3.msra.mxu0 %v7834_v59  ;;  %v7875_v59 = vld [vmem:[%s9433_s3 + $0x78] sm:$0xff] }
 0xe20   : > { %7550 = vmatprep.subr.mxu0 %v9491_v49 }
 0xed8   : > { %v4574_v62 = vpop.f32.mrf.mxu0 }
 0xed9   : > { %v4575_v56 = vadd.f32 %v9530_v16, %v4574_v62  ;;  %v7876_v62 = vld [vmem:[%s9433_s3 + $0x70] sm:$0xff]  ;;  %v7877_v16 = vld [vmem:[%s9433_s3 + $0x68] sm:$0xff] }
 0xeda   : > { %v7519_v55 = vpop.f32.mrf.mxu0 }
 0xedb   : > { %v4578_v4 = vmax.f32 %v4575_v56, 0.0  ;;  %v7878_v56 = vld [vmem:[%s9433_s3 + $0x60] sm:$0xff] }
 0xedd   : > { %7537 = vmatmul.mubr.msk.f32.vlgmr.msra.gmra.mxu1 %vm2605_vm3, %v4578_v4 }
 0xede   : > { %7562 = vmatpush3.msra.mxu1 %v7835_v6  ;;  %7569 = vmatprep.mubr.msk.f32.mxu1 %vm7923_vm1, %v9491_v49 }
 0xedf   : > { %7563 = vmatprep.subr.mxu1 %v9491_v49 }
 0xee0   : > { %7564 = vmatpush3.msra.mxu1 %v7836_v8 }
 0xee1   : > { %7565 = vmatprep.subr.mxu1 %v9491_v49 }
 0xee2   : > { %7566 = vmatpush3.msra.mxu1 %v7837_v11 }
 0xee3   : > { %7567 = vmatprep.subr.mxu1 %v9491_v49 }
 0xee4   : > { %7568 = vmatpush3.msra.mxu1 %v7838_v13  ;;  %v7879_v13 = vld [vmem:[%s9434_s4] ss:$0 sm:$0xff] }
 0xee5   : > { %7583 = vmatprep.subr.mxu1 %v9491_v49 }
 0xf9d   : > { %v4648_v58 = vpop.f32.mrf.mxu1 }
 0xf9e   : > { %v4649_v1 = vadd.f32 %v8720_v10, %v4648_v58 }
 0xf9f   : > { %v7538_v15 = vpop.f32.mrf.mxu1 }
 0xfa0   : > { %v4652_v17 = vadd.f32 %v4649_v1, %v4504_v12  ;;  %v7871_v12 = vld [vmem:[%s9433_s3 + $0x38] sm:$0xff]  ;;  %v7880_v15 = vld [vmem:[%s9435_s5] ss:$0 sm:$0xff] }
 0xfa2   : > { %v4653_v47 = vsel %vm652_vm0, %v4652_v17, 0.0 }
 0xfa3   : > { %4654 = vadd.xlane.f32.xlu0 %v4653_v47 }
0x102c   : > { %v4655_v19 = vpop.xlane.xlu0 %4654 }
0x102d   : > { %v4656_v52 = vmul.f32 0.03125, %v4655_v19 }
0x102f   : > { %v4657_v18 = vsub.f32 %v4652_v17, %v4656_v52 }
0x1031   : > { %v4658_v20 = vmul.f32 %v4657_v18, %v4657_v18 }
0x1033   : > { %v4659_v21 = vsel %vm652_vm0, %v4658_v20, 0.0  ;;  %v7881_v20 = vld [vmem:[%s9434_s4 + $0x2] ss:$0 sm:$0xff] }
0x1034   : > { %4660 = vadd.xlane.f32.xlu1 %v4659_v21 }
0x10bd   : > { %v4661_v22 = vpop.xlane.xlu1 %4660 }
0x10be   : > { %v4662_v50 = vmul.f32 0.03125, %v4661_v22 }
0x10c0   : > { %v4663_v2 = vadd.f32 1e-05, %v4662_v50  ;;  %v7882_v50 = vld [vmem:[%s9435_s5 + $0x2] ss:$0 sm:$0xff] }
0x10c2   : > { %7809 = vrsqrt.f32 %v4663_v2 }
0x10cf   : > { %v7810_v45 = vpop.eup %7809 }
0x10d0   : > { %v4665_v53 = vmul.f32 %v7810_v45, %v4657_v18 }
0x10d2   : > { %v4666_v10 = vmul.f32 %v8728_v51, %v4665_v53  ;;  %v7841_v51 = vld [vmem:[%s9478_s28 + $0x30] sm:$0xff] }
0x10d4   : > { %v9023_v9 = vadd.f32 %v8733_v63, %v4666_v10  ;;  %v7842_v63 = vld [vmem:[%s9432_s2 + $0x10] sm:$0xff] }
0x10d6   : > { %7548 = vmatmul.mubr.msk.f32.vlgmr.msra.gmra.mxu0 %vm652_vm0, %v9023_v9  ;;  %7570 = vmatmul.mubr.msk.f32.vlgmr.msra.gmra.mxu1 %vm652_vm0, %v9023_v9 }
0x10d7   : > { %7551 = vmatpush3.msra.mxu0 %v7839_v48  ;;  %7584 = vmatpush3.msra.mxu1 %v7840_v46  ;;  %v7883_v48 = vld [vmem:[%s9434_s4 + $0x1] ss:$0 sm:$0xff] }
0x10d8   : > { %7552 = vmatprep.subr.mxu0 %v9491_v49  ;;  %7585 = vmatprep.subr.mxu1 %v9491_v49 }
0x10d9   : > { %7553 = vmatpush3.msra.mxu0 %v7841_v51  ;;  %7586 = vmatpush3.msra.mxu1 %v7842_v63  ;;  %v7884_v63 = vld [vmem:[%s9435_s5 + $0x1] ss:$0 sm:$0xff] }
0x10da   : > { %7554 = vmatprep.subr.mxu0 %v9491_v49  ;;  %7587 = vmatprep.subr.mxu1 %v9491_v49 }
0x10db   : > { %7555 = vmatpush3.msra.mxu0 %v7843_v43  ;;  %7588 = vmatpush3.msra.mxu1 %v7844_v41 }
0x10dc   : > { %7556 = vmatprep.subr.mxu0 %v9491_v49  ;;  %7589 = vmatprep.subr.mxu1 %v9491_v49 }
0x10dd   : > { %7557 = vmatpush3.msra.mxu0 %v7845_v23  ;;  %7558 = vmatprep.mubr.msk.f32.mxu0 %vm7923_vm1, %v9491_v49  ;;  %v7885_v23 = vld [vmem:[%s9436_s6] ss:$0 sm:$0xff] }
0x10de   : > { %7590 = vmatpush3.msra.mxu1 %v7846_v24  ;;  %7591 = vmatprep.mubr.msk.f32.mxu1 %vm7923_vm1, %v9491_v49 }
0x10df   : > { %7559 = vmatmul.mubr.msk.f32.vlgmr.msra.gmra.mxu0 %vm652_vm0, %v9023_v9  ;;  %7572 = vmatprep.subr.mxu0 %v9491_v49 }
0x10e0   : > { %7592 = vmatmul.mubr.msk.f32.vlgmr.msra.gmra.mxu1 %vm652_vm0, %v9023_v9  ;;  %7605 = vmatprep.subr.mxu1 %v9491_v49 }
0x10e1   : > { %7573 = vmatpush3.msra.mxu0 %v7847_v25  ;;  %7606 = vmatpush3.msra.mxu1 %v7848_v26 }
0x10e2   : > { %7574 = vmatprep.subr.mxu0 %v9491_v49  ;;  %7607 = vmatprep.subr.mxu1 %v9491_v49 }
0x10e3   : > { %7575 = vmatpush3.msra.mxu0 %v7849_v27  ;;  %7608 = vmatpush3.msra.mxu1 %v7850_v28  ;;  %v7886_v28 = vld [vmem:[%s9434_s4 + $0x3] ss:$0 sm:$0xff] }
0x10e4   : > { %7576 = vmatprep.subr.mxu0 %v9491_v49  ;;  %7609 = vmatprep.subr.mxu1 %v9491_v49 }
0x10e5   : > { %7577 = vmatpush3.msra.mxu0 %v7851_v29  ;;  %7610 = vmatpush3.msra.mxu1 %v7852_v0 }
0x10e6   : > { %7578 = vmatprep.subr.mxu0 %v9491_v49  ;;  %7611 = vmatprep.subr.mxu1 %v9491_v49 }
0x10e7   : > { %7579 = vmatpush3.msra.mxu0 %v7853_v30  ;;  %7580 = vmatprep.mubr.msk.f32.mxu0 %vm7923_vm1, %v9491_v49  ;;  %v7887_v30 = vld [vmem:[%s9435_s5 + $0x3] ss:$0 sm:$0xff] }
0x10e8   : > { %7612 = vmatpush3.msra.mxu1 %v7854_v31  ;;  %7613 = vmatprep.mubr.msk.f32.mxu1 %vm7923_vm1, %v9491_v49 }
0x10e9   : > { %7581 = vmatmul.mubr.msk.f32.vlgmr.msra.gmra.mxu0 %vm652_vm0, %v9023_v9  ;;  %7594 = vmatprep.subr.mxu0 %v9491_v49 }
0x10ea   : > { %7614 = vmatmul.mubr.msk.f32.vlgmr.msra.gmra.mxu1 %vm652_vm0, %v9023_v9  ;;  %7627 = vmatprep.subr.mxu1 %v9491_v49 }
0x10eb   : > { %7595 = vmatpush3.msra.mxu0 %v7855_v32  ;;  %7628 = vmatpush3.msra.mxu1 %v7856_v3 }
0x10ec   : > { %7596 = vmatprep.subr.mxu0 %v9491_v49  ;;  %7629 = vmatprep.subr.mxu1 %v9491_v49 }
0x10ed   : > { %7597 = vmatpush3.msra.mxu0 %v7857_v33  ;;  %7630 = vmatpush3.msra.mxu1 %v7858_v34 }
0x10ee   : > { %7598 = vmatprep.subr.mxu0 %v9491_v49  ;;  %7631 = vmatprep.subr.mxu1 %v9491_v49 }
0x10ef   : > { %7599 = vmatpush3.msra.mxu0 %v7859_v35  ;;  %7632 = vmatpush3.msra.mxu1 %v7860_v36  ;;  %v7888_v36 = vld [vmem:[%s9436_s6 + $0x1] ss:$0 sm:$0xff] }
0x10f0   : > { %7600 = vmatprep.subr.mxu0 %v9491_v49  ;;  %7633 = vmatprep.subr.mxu1 %v9491_v49 }
0x10f1   : > { %7601 = vmatpush3.msra.mxu0 %v7861_v37  ;;  %7602 = vmatprep.mubr.msk.f32.mxu0 %vm7923_vm1, %v9491_v49 }
0x10f2   : > { %7634 = vmatpush3.msra.mxu1 %v7862_v38  ;;  %7635 = vmatprep.mubr.msk.f32.mxu1 %vm7923_vm1, %v9491_v49 }
0x10f3   : > { %7603 = vmatmul.mubr.msk.f32.vlgmr.msra.gmra.mxu0 %vm652_vm0, %v9023_v9  ;;  %7616 = vmatprep.subr.mxu0 %v9491_v49 }
0x10f4   : > { %7636 = vmatmul.mubr.msk.f32.vlgmr.msra.gmra.mxu1 %vm652_vm0, %v9023_v9  ;;  %7649 = vmatprep.subr.mxu1 %v9491_v49 }
0x10f5   : > { %7617 = vmatpush3.msra.mxu0 %v7863_v39  ;;  %7650 = vmatpush3.msra.mxu1 %v7864_v40 }
0x10f6   : > { %7618 = vmatprep.subr.mxu0 %v9491_v49  ;;  %7651 = vmatprep.subr.mxu1 %v9491_v49 }
0x10f7   : > { %7619 = vmatpush3.msra.mxu0 %v7865_v42  ;;  %7652 = vmatpush3.msra.mxu1 %v7866_v44 }
0x10f8   : > { %7620 = vmatprep.subr.mxu0 %v9491_v49  ;;  %7653 = vmatprep.subr.mxu1 %v9491_v49 }
0x10f9   : > { %7621 = vmatpush3.msra.mxu0 %v7867_v61  ;;  %7654 = vmatpush3.msra.mxu1 %v7868_v57 }
0x10fa   : > { %7622 = vmatprep.subr.mxu0 %v9491_v49  ;;  %7655 = vmatprep.subr.mxu1 %v9491_v49 }
0x10fb   : > { %7623 = vmatpush3.msra.mxu0 %v7869_v5  ;;  %7624 = vmatprep.mubr.msk.f32.mxu0 %vm7923_vm1, %v9491_v49 }
0x10fc   : > { %7656 = vmatpush3.msra.mxu1 %v7870_v7  ;;  %7657 = vmatprep.mubr.msk.f32.mxu1 %vm7923_vm1, %v9491_v49 }
0x10fd   : > { %7625 = vmatmul.mubr.msk.f32.vlgmr.msra.gmra.mxu0 %vm652_vm0, %v9023_v9  ;;  %7638 = vmatprep.subr.mxu0 %v9491_v49 }
0x10fe   : > { %7658 = vmatmul.mubr.msk.f32.vlgmr.msra.gmra.mxu1 %vm652_vm0, %v9023_v9  ;;  %7639 = vmatpush3.msra.mxu0 %v7871_v12 }
0x10ff   : > { %7640 = vmatprep.subr.mxu0 %v9491_v49  ;;  %7646 = vmatprep.mubr.msk.f32.mxu0 %vm7923_vm1, %v9491_v49 }
0x1100   : > { %7641 = vmatpush3.msra.mxu0 %v7872_v54  ;;  %7671 = vmatprep.subr.mxu1 %v9491_v49 }
0x1101   : > { %7642 = vmatprep.subr.mxu0 %v9491_v49  ;;  %7673 = vmatprep.mubr.msk.f32.mxu1 %vm7923_vm1, %v9491_v49 }
0x1102   : > { %7643 = vmatpush3.msra.mxu0 %v7873_v14 }
0x1103   : > { %7644 = vmatprep.subr.mxu0 %v9491_v49 }
0x1104   : > { %7645 = vmatpush3.msra.mxu0 %v7874_v60 }
0x1105   : > { %7647 = vmatmul.mubr.msk.f32.vlgmr.msra.gmra.mxu0 %vm652_vm0, %v9023_v9  ;;  %7660 = vmatprep.subr.mxu0 %v9491_v49 }
0x1106   : > { %7661 = vmatpush3.msra.mxu0 %v7875_v59  ;;  %7668 = vmatprep.mubr.msk.f32.mxu0 %vm7923_vm1, %v9491_v49 }
0x1107   : > { %7662 = vmatprep.subr.mxu0 %v9491_v49 }
0x1108   : > { %7663 = vmatpush3.msra.mxu0 %v7876_v62 }
0x1109   : > { %7664 = vmatprep.subr.mxu0 %v9491_v49 }
0x110a   : > { %7665 = vmatpush3.msra.mxu0 %v7877_v16 }
0x110b   : > { %7666 = vmatprep.subr.mxu0 %v9491_v49 }
0x110c   : > { %7667 = vmatpush3.msra.mxu0 %v7878_v56 }
0x110d   : > { %7669 = vmatmul.mubr.msk.f32.vlgmr.msra.gmra.mxu0 %vm652_vm0, %v9023_v9  ;;  %7681 = vmatprep.subr.mxu0 %v9491_v49 }
0x110e   : > { %7683 = vmatprep.mubr.msk.f32.mxu0 %vm7923_vm1, %v9491_v49 }
0x1196   : > { %v4737_v55 = vpop.f32.mrf.mxu0  ;;  %v4877_v4 = vpop.f32.mrf.mxu1 }
0x1197   : > { %v4738_v58 = vadd.f32 %v7879_v13, %v4737_v55  ;;  %v4878_v21 = vadd.f32 %v7881_v20, %v4877_v4 }
0x1198   : > { %v7549_v6 = vpop.f32.mrf.mxu0  ;;  %v7571_v8 = vpop.f32.mrf.mxu1 }
0x1199   : > { %v4951_v52 = vmul.f32 0.35355338, %v4738_v58  ;;  %v4953_v10 = vmul.f32 0.35355338, %v4878_v21 }
0x119f   : > { %v4807_v11 = vpop.f32.mrf.mxu0 }
0x11a0   : > { %v5021_v1 = vpop.f32.mrf.mxu1  ;;  %v4808_v46 = vadd.f32 %v7883_v48, %v4807_v11  ;;  %v7889_v48 = vld [vmem:[%s9436_s6 + $0x2] ss:$0 sm:$0xff] }
0x11a1   : > { %v5022_v17 = vadd.f32 %v7880_v15, %v5021_v1  ;;  %v7560_v47 = vpop.f32.mrf.mxu0 }
0x11a2   : > { %v7593_v19 = vpop.f32.mrf.mxu1  ;;  %v4952_v27 = vmul.f32 0.35355338, %v4808_v46 }
0x11a3   : > { %7672 = vmatpush3.xpose.msk.msra.mxu1 %vm1548_vm2, %v5022_v17 }
0x11a4   : > { %7676 = vmatprep.subr.mxu1 %v9491_v49 }
0x11a6   : > { %7674 = vmatmul.mubr.msk.f32.vlgmr.msra.gmra.mxu1 %vm1548_vm2, %v4951_v52 }
0x11a7   : > { %7678 = vmatprep.mubr.msk.f32.mxu1 %vm7923_vm1, %v9491_v49 }
0x11a9   : > { %v4947_v18 = vpop.f32.mrf.mxu0 }
0x11aa   : > { %v5161_v22 = vpop.f32.mrf.mxu1  ;;  %v4948_v29 = vadd.f32 %v7886_v28, %v4947_v18 }
0x11ab   : > { %v5162_v2 = vadd.f32 %v7882_v50, %v5161_v22  ;;  %v7582_v45 = vpop.f32.mrf.mxu0 }
0x11ac   : > { %v7615_v53 = vpop.f32.mrf.mxu1  ;;  %v4954_v34 = vmul.f32 0.35355338, %v4948_v29 }
0x11ad   : > { %7682 = vmatpush3.xpose.msk.msra.mxu0 %vm1548_vm2, %v5162_v2 }
0x11ae   : > { %7691 = vmatprep.subr.mxu0 %v9491_v49 }
0x11b0   : > { %7684 = vmatmul.mubr.msk.f32.vlgmr.msra.gmra.mxu0 %vm1548_vm2, %v4953_v10 }
0x11b1   : > { %7693 = vmatprep.mubr.msk.f32.mxu0 %vm7923_vm1, %v9491_v49 }
0x11b3   : > { %v5091_v51 = vpop.f32.mrf.mxu0 }
0x11b4   : > { %v5092_v43 = vadd.f32 %v7884_v63, %v5091_v51  ;;  %v5301_v41 = vpop.f32.mrf.mxu1 }
0x11b5   : > { %v5302_v24 = vadd.f32 %v7885_v23, %v5301_v41  ;;  %v7604_v25 = vpop.f32.mrf.mxu0  ;;  %v7890_v41 = vld [vmem:[%s9437_s7 + $0x8] sm:$0xff] }
0x11b6   : > { %v7637_v26 = vpop.f32.mrf.mxu1  ;;  %7677 = vmatpush3.xpose.msk.msra.mxu1 %vm1548_vm2, %v5092_v43 }
0x11b7   : > { %7692 = vmatpush3.msra.mxu0 %v5302_v24  ;;  %7686 = vmatprep.subr.mxu1 %v9491_v49  ;;  %v7891_v26 = vld [vmem:[%s9436_s6 + $0x3] ss:$0 sm:$0xff] }
0x11b8   : > { %7701 = vmatprep.subr.mxu0 %v9491_v49 }
0x11b9   : > { %7679 = vmatmul.mubr.msk.f32.vlgmr.msra.gmra.mxu1 %vm1548_vm2, %v4952_v27 }
0x11ba   : > { %7688 = vmatprep.mubr.msk.f32.mxu1 %vm7923_vm1, %v9491_v49 }
0x11bd   : > { %v5231_v0 = vpop.f32.mrf.mxu0 }
0x11be   : > { %v5232_v31 = vadd.f32 %v7887_v30, %v5231_v0  ;;  %v9276_v32 = vpop.f32.mrf.mxu1  ;;  %v7892_v0 = vld [vmem:[%s9437_s7] sm:$0xff] }
0x11bf   : > { %v7626_v3 = vpop.f32.mrf.mxu0  ;;  %v5442_v46 = vadd.f32 %v7889_v48, %v9276_v32  ;;  %v7893_v32 = vld [vmem:[%s9437_s7 + $0x18] sm:$0xff] }
0x11c0   : > { %v7659_v33 = vpop.f32.mrf.mxu1  ;;  %7687 = vmatpush3.xpose.msk.msra.mxu1 %vm1548_vm2, %v5232_v31 }
0x11c1   : > { %7696 = vmatprep.subr.mxu1 %v9491_v49 }
0x11c3   : > { %7689 = vmatmul.mubr.msk.f32.vlgmr.msra.gmra.mxu1 %vm1548_vm2, %v4954_v34 }
0x11c4   : > { %7698 = vmatprep.mubr.msk.f32.mxu1 %vm7923_vm1, %v9491_v49 }
0x11c5   : > { %v5371_v35 = vpop.f32.mrf.mxu0 }
0x11c6   : > { %v5372_v37 = vadd.f32 %v7888_v36, %v5371_v35  ;;  %v7894_v36 = vld [vmem:[%s9437_s7 + $0x10] sm:$0xff] }
0x11c7   : > { %v7648_v38 = vpop.f32.mrf.mxu0 }
0x11c8   : > { %7697 = vmatpush3.msra.mxu1 %v5372_v37  ;;  %v7895_v37 = vld [vmem:[%s9441_s11 + $0x18] sm:$0xff]  ;;  %v7896_v38 = vld [vmem:[%s9441_s11 + $0x10] sm:$0xff] }
0x11c9   : > { %7706 = vmatprep.subr.mxu1 %v9491_v49 }
0x11cd   : > { %v9287_v39 = vpop.f32.mrf.mxu0 }
0x11ce   : > { %v5512_v27 = vadd.f32 %v7891_v26, %v9287_v39 }
0x11cf   : > { %v7670_v40 = vpop.f32.mrf.mxu0 }
0x11d0   : > { %v7897_v40 = vld [vmem:[%s9441_s11 + $0x8] sm:$0xff] }
0x1266   : > { %v5587_v42 = vpop.f32.mrf.mxu1 }
0x1267   : > { %v5819_v44 = vsel %vm1548_vm2, %v5587_v42, -inf }
0x1268   : > { %5820 = vmax.xlane.f32.xlu0 %v5819_v44  ;;  %v7675_v61 = vpop.f32.mrf.mxu1  ;;  %v7898_v44 = vld [vmem:[%s9441_s11] sm:$0xff] }
0x1269   : > { %v7899_v61 = vld [vmem:[%s9443_s13 + $0x38] sm:$0xff] }
0x1270   : > { %v5739_v57 = vpop.f32.mrf.mxu0 }
0x1271   : > { %v5825_v5 = vsel %vm1548_vm2, %v5739_v57, -inf }
0x1272   : > { %5826 = vmax.xlane.f32.xlu0 %v5825_v5  ;;  %v7685_v7 = vpop.f32.mrf.mxu0  ;;  %v7901_v5 = vld [vmem:[%s9443_s13 + $0x28] sm:$0xff] }
0x1273   : > { %v7902_v7 = vld [vmem:[%s9443_s13 + $0x20] sm:$0xff] }
0x1279   : > { %v5663_v12 = vpop.f32.mrf.mxu1 }
0x127a   : > { %v5822_v54 = vsel %vm1548_vm2, %v5663_v12, -inf }
0x127b   : > { %5823 = vmax.xlane.f32.xlu1 %v5822_v54  ;;  %v7680_v14 = vpop.f32.mrf.mxu1  ;;  %v7904_v54 = vld [vmem:[%s9443_s13 + $0x10] sm:$0xff] }
0x127c   : > { %v7905_v14 = vld [vmem:[%s9443_s13 + $0x8] sm:$0xff] }
0x1283   : > { %v5815_v60 = vpop.f32.mrf.mxu1 }
0x1284   : > { %v5828_v59 = vsel %vm1548_vm2, %v5815_v60, -inf }
0x1285   : > { %5829 = vmax.xlane.f32.xlu1 %v5828_v59  ;;  %v7690_v62 = vpop.f32.mrf.mxu1 }
0x12f1   : > { %v5821_v16 = vpop.xlane.xlu0 %5820 }
0x12f2   : > { %v5831_v56 = vsub.f32 %v5587_v42, %v5821_v16 }
0x12f4   : > { %v5835_v55 = vmul.f32 1.442695, %v5831_v56 }
0x12f6   : > { %7811 = vpow2.f32 %v5835_v55 }
0x12fb   : > { %v5827_v4 = vpop.xlane.xlu0 %5826 }
0x12fc   : > { %v5833_v6 = vsub.f32 %v5739_v57, %v5827_v4  ;;  %v7900_v57 = vld [vmem:[%s9443_s13 + $0x30] sm:$0xff] }
0x12fe   : > { %v5839_v8 = vmul.f32 1.442695, %v5833_v6 }
0x1300   : > { %7813 = vpow2.f32 %v5839_v8 }
0x1303   : > { %v7812_v11 = vpop.eup %7811 }
0x1304   : > { %v5824_v13 = vpop.xlane.xlu1 %5823  ;;  %v5843_v58 = vsel %vm1548_vm2, %v7812_v11, 0.0 }
0x1305   : > { %v5832_v1 = vsub.f32 %v5663_v12, %v5824_v13  ;;  %5844 = vadd.xlane.f32.xlu0 %v5843_v58  ;;  %v7903_v12 = vld [vmem:[%s9443_s13 + $0x18] sm:$0xff] }
0x1307   : > { %v5837_v15 = vmul.f32 1.442695, %v5832_v1 }
0x1309   : > { %7815 = vpow2.f32 %v5837_v15 }
0x130d   : > { %v7814_v17 = vpop.eup %7813 }
0x130e   : > { %v5830_v47 = vpop.xlane.xlu1 %5829  ;;  %v5849_v19 = vsel %vm1548_vm2, %v7814_v17, 0.0 }
0x130f   : > { %v5834_v52 = vsub.f32 %v5815_v60, %v5830_v47  ;;  %5850 = vadd.xlane.f32.xlu0 %v5849_v19  ;;  %v7906_v60 = vld [vmem:[%s9443_s13] sm:$0xff] }
0x1311   : > { %v5841_v18 = vmul.f32 1.442695, %v5834_v52 }
0x1313   : > { %7817 = vpow2.f32 %v5841_v18 }
0x1316   : > { %v7816_v20 = vpop.eup %7815 }
0x1317   : > { %v5846_v21 = vsel %vm1548_vm2, %v7816_v20, 0.0 }
0x1318   : > { %5847 = vadd.xlane.f32.xlu1 %v5846_v21 }
0x1320   : > { %v7818_v22 = vpop.eup %7817 }
0x1321   : > { %v5852_v50 = vsel %vm1548_vm2, %v7818_v22, 0.0 }
0x1322   : > { %5853 = vadd.xlane.f32.xlu1 %v5852_v50 }
0x138e   : > { %v5845_v2 = vpop.xlane.xlu0 %5844 }
0x138f   : > { %7819 = vrcp.f32 %v5845_v2 }
0x1398   : > { %v5851_v45 = vpop.xlane.xlu0 %5850 }
0x1399   : > { %7821 = vrcp.f32 %v5851_v45 }
0x139c   : > { %v7820_v53 = vpop.eup %7819 }
0x139d   : > { %v5859_v10 = vmul.f32 %v7820_v53, %v7812_v11 }
0x139f   : > { %7694 = vmatmul.mubr.msk.f32.vlgmr.msra.gmra.mxu0 %vm1548_vm2, %v5859_v10  ;;  %v7909_v10 = vld [vmem:[%s9440_s10] ss:$0 sm:$0xff] }
0x13a0   : > { %7702 = vmatpush3.msra.mxu0 %v5442_v46  ;;  %7703 = vmatprep.mubr.msk.f32.mxu0 %vm7923_vm1, %v9491_v49 }
0x13a1   : > { %v5848_v51 = vpop.xlane.xlu1 %5847  ;;  %7711 = vmatprep.subr.mxu0 %v9491_v49 }
0x13a2   : > { %7823 = vrcp.f32 %v5848_v51  ;;  %v7910_v51 = vld [vmem:[%s9442_s12] ss:$0 sm:$0xff] }
0x13a6   : > { %v7822_v63 = vpop.eup %7821 }
0x13a7   : > { %v5861_v43 = vmul.f32 %v7822_v63, %v7814_v17 }
0x13a9   : > { %7704 = vmatmul.mubr.msk.f32.vlgmr.msra.gmra.mxu0 %vm1548_vm2, %v5861_v43 }
0x13aa   : > { %7712 = vmatpush3.msra.mxu0 %v7890_v41  ;;  %7713 = vmatprep.mubr.msk.f32.mxu0 %vm7923_vm1, %v9491_v49 }
0x13ab   : > { %v5854_v23 = vpop.xlane.xlu1 %5853  ;;  %7721 = vmatprep.subr.mxu0 %v9491_v49 }
0x13ac   : > { %7825 = vrcp.f32 %v5854_v23 }
0x13af   : > { %v7824_v24 = vpop.eup %7823 }
0x13b0   : > { %v5860_v25 = vmul.f32 %v7824_v24, %v7816_v20  ;;  %v7911_v24 = vld [vmem:[%s9444_s14] ss:$0 sm:$0xff] }
0x13b2   : > { %7699 = vmatmul.mubr.msk.f32.vlgmr.msra.gmra.mxu1 %vm1548_vm2, %v5860_v25 }
0x13b3   : > { %7707 = vmatpush3.msra.mxu1 %v5512_v27  ;;  %7708 = vmatprep.mubr.msk.f32.mxu1 %vm7923_vm1, %v9491_v49 }
0x13b4   : > { %7716 = vmatprep.subr.mxu1 %v9491_v49 }
0x13b9   : > { %v7826_v28 = vpop.eup %7825 }
0x13ba   : > { %v5862_v29 = vmul.f32 %v7826_v28, %v7818_v22 }
0x13bc   : > { %7709 = vmatmul.mubr.msk.f32.vlgmr.msra.gmra.mxu1 %vm1548_vm2, %v5862_v29 }
0x13bd   : > { %7717 = vmatpush3.msra.mxu1 %v7892_v0  ;;  %7718 = vmatprep.mubr.msk.f32.mxu1 %vm7923_vm1, %v9491_v49 }
0x13be   : > { %7726 = vmatprep.subr.mxu1 %v9491_v49 }
0x145f   : > { %v5932_v30 = vpop.f32.mrf.mxu0 }
0x1460   : > { %7719 = vmatmul.mubr.msk.f32.vlgmr.msra.gmra.mxu1 %vm1548_vm2, %v5932_v30 }
0x1461   : > { %v7695_v31 = vpop.f32.mrf.mxu0  ;;  %7727 = vmatpush3.msra.mxu1 %v7893_v32  ;;  %7728 = vmatprep.mubr.msk.f32.mxu1 %vm7923_vm1, %v9491_v49 }
0x1462   : > { %7742 = vmatprep.subr.mxu1 %v9491_v49 }
0x1469   : > { %v6078_v3 = vpop.f32.mrf.mxu0 }
0x146b   : > { %v7705_v33 = vpop.f32.mrf.mxu0 }
0x1472   : > { %v6005_v34 = vpop.f32.mrf.mxu1 }
0x1473   : > { %7714 = vmatmul.mubr.msk.f32.vlgmr.msra.gmra.mxu0 %vm1548_vm2, %v6005_v34 }
0x1474   : > { %v7700_v35 = vpop.f32.mrf.mxu1  ;;  %7722 = vmatpush3.msra.mxu0 %v7894_v36  ;;  %7723 = vmatprep.mubr.msk.f32.mxu0 %vm7923_vm1, %v9491_v49 }
0x1475   : > { %7731 = vmatprep.subr.mxu0 %v9491_v49 }
0x1477   : > { %7724 = vmatmul.mubr.msk.f32.vlgmr.msra.gmra.mxu0 %vm1548_vm2, %v6078_v3 }
0x1478   : > { %7732 = vmatpush3.msra.mxu0 %v7895_v37  ;;  %7739 = vmatprep.mubr.msk.f32.mxu0 %vm7923_vm1, %v9491_v49  ;;  %v7912_v37 = vld [vmem:[%s9445_s15] ss:$0 sm:$0xff] }
0x1479   : > { %7733 = vmatprep.subr.mxu0 %v9491_v49 }
0x147a   : > { %7734 = vmatpush3.msra.mxu0 %v7896_v38 }
0x147b   : > { %7735 = vmatprep.subr.mxu0 %v9491_v49 }
0x147c   : > { %v6151_v39 = vpop.f32.mrf.mxu1  ;;  %7736 = vmatpush3.msra.mxu0 %v7897_v40 }
0x147d   : > { %7729 = vmatmul.mubr.msk.f32.vlgmr.msra.gmra.mxu1 %vm1548_vm2, %v6151_v39  ;;  %7737 = vmatprep.subr.mxu0 %v9491_v49  ;;  %v7913_v39 = vld [vmem:[%s9446_s16] ss:$0 sm:$0xff] }
0x147e   : > { %v7710_v42 = vpop.f32.mrf.mxu1  ;;  %7738 = vmatpush3.msra.mxu0 %v7898_v44  ;;  %7743 = vmatpush3.msra.mxu1 %v7899_v61 }
0x147f   : > { %7744 = vmatprep.subr.mxu1 %v9491_v49  ;;  %7758 = vmatprep.mubr.msk.f32.mxu1 %vm7923_vm1, %v9491_v49 }
0x1480   : > { %7745 = vmatpush3.msra.mxu1 %v7900_v57 }
0x1481   : > { %7746 = vmatprep.subr.mxu1 %v9491_v49 }
0x1482   : > { %7747 = vmatpush3.msra.mxu1 %v7901_v5 }
0x1483   : > { %7748 = vmatprep.subr.mxu1 %v9491_v49 }
0x1484   : > { %7749 = vmatpush3.msra.mxu1 %v7902_v7 }
0x1485   : > { %7750 = vmatprep.subr.mxu1 %v9491_v49 }
0x1486   : > { %7751 = vmatpush3.msra.mxu1 %v7903_v12 }
0x1487   : > { %7752 = vmatprep.subr.mxu1 %v9491_v49 }
0x1488   : > { %7753 = vmatpush3.msra.mxu1 %v7904_v54 }
0x1489   : > { %7754 = vmatprep.subr.mxu1 %v9491_v49 }
0x148a   : > { %7755 = vmatpush3.msra.mxu1 %v7905_v14 }
0x148b   : > { %7756 = vmatprep.subr.mxu1 %v9491_v49  ;;  %v7907_v49 = vld [vmem:[%s9438_s8] ss:$0 sm:$0xff] }
0x148c   : > { %7757 = vmatpush3.msra.mxu1 %v7906_v60 }
0x1520   : > { %v6297_v59 = vpop.f32.mrf.mxu1 }
0x1522   : > { %v7720_v62 = vpop.f32.mrf.mxu1 }
0x1533   : > { %v6224_v16 = vpop.f32.mrf.mxu0 }
0x1534   : > { %v6298_v6 = vadd.f32 %v6297_v59, %v6224_v16 }
0x1535   : > { %v7715_v56 = vpop.f32.mrf.mxu0 }
0x1537   : > { %v6370_v55 = vpop.f32.mrf.mxu0 }
0x1538   : > { %v6374_v8 = vadd.f32 %v6370_v55, %v6298_v6 }
0x1539   : > { %v7725_v4 = vpop.f32.mrf.mxu0 }
0x153d   : > { %v6444_v11 = vpop.f32.mrf.mxu1 }
0x153e   : > { %v6448_v13 = vadd.f32 %v6444_v11, %v6374_v8 }
0x153f   : > { %v7730_v58 = vpop.f32.mrf.mxu1 }
0x1540   : > { %v6449_v1 = vadd.f32 %v7907_v49, %v6448_v13 }
0x1542   : > { %v6450_v15 = vadd.f32 %v6449_v1, %v9023_v9  ;;  %v7908_v9 = vld [vmem:[%s9439_s9] ss:$0 sm:$0xff] }
0x1544   : > { %v6451_v17 = vsel %vm652_vm0, %v6450_v15, 0.0 }
0x1545   : > { %6452 = vadd.xlane.f32.xlu0 %v6451_v17 }
0x15ce   : > { %v6453_v47 = vpop.xlane.xlu0 %6452 }
0x15cf   : > { %v6454_v19 = vmul.f32 0.03125, %v6453_v47 }
0x15d1   : > { %v6455_v52 = vsub.f32 %v6450_v15, %v6454_v19 }
0x15d3   : > { %v6456_v18 = vmul.f32 %v6455_v52, %v6455_v52 }
0x15d5   : > { %v6457_v20 = vsel %vm652_vm0, %v6456_v18, 0.0 }
0x15d6   : > { %6458 = vadd.xlane.f32.xlu1 %v6457_v20 }
0x165f   : > { %v6459_v21 = vpop.xlane.xlu1 %6458 }
0x1660   : > { %v6460_v22 = vmul.f32 0.03125, %v6459_v21 }
0x1662   : > { %v6461_v50 = vadd.f32 1e-05, %v6460_v22 }
0x1664   : > { %7827 = vrsqrt.f32 %v6461_v50 }
0x1671   : > { %v7828_v2 = vpop.eup %7827 }
0x1672   : > { %v6463_v45 = vmul.f32 %v7828_v2, %v6455_v52 }
0x1674   : > { %v6464_v53 = vmul.f32 %v7908_v9, %v6463_v45 }
0x1676   : > { %v6465_v48 = vadd.f32 %v7909_v10, %v6464_v53 }
0x1678   : > { %7740 = vmatmul.mubr.msk.f32.vlgmr.msra.gmra.mxu0 %vm652_vm0, %v6465_v48 }
0x1738   : > { %v6535_v46 = vpop.f32.mrf.mxu0 }
0x1739   : > { %v6536_v63 = vadd.f32 %v7910_v51, %v6535_v46 }
0x173a   : > { %v7741_v43 = vpop.f32.mrf.mxu0 }
0x173b   : > { %v6539_v41 = vmax.f32 %v6536_v63, 0.0 }
0x173d   : > { %7759 = vmatmul.mubr.msk.f32.vlgmr.msra.gmra.mxu1 %vm2605_vm3, %v6539_v41 }
0x17fd   : > { %v6609_v23 = vpop.f32.mrf.mxu1 }
0x17fe   : > { %v6610_v25 = vadd.f32 %v7911_v24, %v6609_v23 }
0x17ff   : > { %v7760_v26 = vpop.f32.mrf.mxu1 }
0x1800   : > { %v6613_v27 = vadd.f32 %v6610_v25, %v6465_v48 }
0x1802   : > { %v6614_v28 = vsel %vm652_vm0, %v6613_v27, 0.0 }
0x1803   : > { %6615 = vadd.xlane.f32.xlu0 %v6614_v28 }
0x188c   : > { %v6616_v29 = vpop.xlane.xlu0 %6615 }
0x188d   : > { %v6617_v0 = vmul.f32 0.03125, %v6616_v29 }
0x188f   : > { %v6618_v30 = vsub.f32 %v6613_v27, %v6617_v0 }
0x1891   : > { %v6619_v31 = vmul.f32 %v6618_v30, %v6618_v30 }
0x1893   : > { %v6620_v32 = vsel %vm652_vm0, %v6619_v31, 0.0 }
0x1894   : > { %6621 = vadd.xlane.f32.xlu1 %v6620_v32 }
0x191d   : > { %v6622_v3 = vpop.xlane.xlu1 %6621 }
0x191e   : > { %v6623_v33 = vmul.f32 0.03125, %v6622_v3 }
0x1920   : > { %v6624_v34 = vadd.f32 1e-05, %v6623_v33 }
0x1922   : > { %7829 = vrsqrt.f32 %v6624_v34 }
0x192f   : > { %v7830_v35 = vpop.eup %7829 }
0x1930   : > { %v6626_v36 = vmul.f32 %v7830_v35, %v6618_v30 }
0x1932   : > { %v6627_v38 = vmul.f32 %v7912_v37, %v6626_v36 }
0x1934   : > { %v6628_v40 = vadd.f32 %v7913_v39, %v6627_v38 }
0x1936   : > { %6629 = vst.msk [vmem:[%s543_s19] sm:$0xff] %vm652_vm0, %v6628_v40 }
0x1937 PF: > { %s27_s24 = sadd.s32 1, %s7920_s24  }
0x1938   : > { %p24_p4 = scmp.ge.s32.totalorder %s27_s24, 4  }
0x193a   :  { %26 = sbr.rel (!%p24_p4) target bundleno = 3 (0x3), region = 118 }

</bundles_post_ra>
